<compile_context>
chip_gen: v7x
topology: tpu7x:2x2x1
jax: 0.10.0
libtpu: 0.0.40
codegen_flags: <defaults>
</compile_context>

<pallas_src>
import jax
import jax.numpy as jnp
from jax.experimental import pallas as pl
from jax.experimental.pallas import tpu as pltpu


# ---------------------------------------------------------------------------
# Fused kernel: conv1(1x1)+bn1+relu -> conv2(3x3,pad1)+bn2+relu -> conv3(1x1)+bn3+res+relu
# ---------------------------------------------------------------------------

def _bottleneck_fused_kernel(x_ref, w1_ref, b1_ref, w2_ref, b2_ref,
                             w3_ref, b3_ref, o_ref, xpad_ref):
    # x_ref : (1, H, W, Cin)   input image tile (also the residual)
    # w1    : (Cin, P)  w2: (3, 3, P, P)  w3: (P, Cout)   (BN scale pre-folded)
    # b1/b2 : (1, P)    b3: (1, Cout)
    # o_ref : (1, H, W, Cout)
    # xpad_ref: VMEM scratch (H+2, W, P) -- conv1 output with zero H-halo rows
    _, H, W, Cin = x_ref.shape
    P = w1_ref.shape[1]
    Cout = w3_ref.shape[1]

    x2d = x_ref[...].reshape(H * W, Cin)              # free: W % 8 == 0

    # ---- conv1 (1x1) + bn1 (scale folded into w1) + relu ----
    h1 = jnp.dot(x2d, w1_ref[...], preferred_element_type=jnp.float32)
    h1 = jnp.maximum(h1 + b1_ref[...], 0.0)

    # ---- conv2 (3x3, pad=1) + bn2 + relu -----------------------------------
    # Zero-pad along H inside VMEM scratch (leading-dim writes are cheap);
    # W shifts are done with XLU rolls + boundary masks (no strided W slices).
    xpad_ref[0, :, :] = jnp.zeros((W, P), jnp.float32)
    xpad_ref[H + 1, :, :] = jnp.zeros((W, P), jnp.float32)
    xpad_ref[pl.ds(1, H), :, :] = h1.reshape(H, W, P)

    xc = xpad_ref[...]                                 # (H+2, W, P)
    col = jax.lax.broadcasted_iota(jnp.int32, (H + 2, W, P), 1)
    # xl[:, w] = xc[:, w+1] (zero at w == W-1) ; xr[:, w] = xc[:, w-1] (zero at w == 0)
    xl = jnp.where(col == W - 1, 0.0, pltpu.roll(xc, shift=W - 1, axis=1))
    xr = jnp.where(col == 0, 0.0, pltpu.roll(xc, shift=1, axis=1))
    shifted = (xr, xc, xl)                             # indexed by kw = 0, 1, 2

    # Bias folded into the accumulator init (saves one full-size VPU add).
    acc = jnp.broadcast_to(b2_ref[...], (H * W, P)).astype(jnp.float32)
    for kh in range(3):
        for kw in range(3):
            src = shifted[kw][kh:kh + H].reshape(H * W, P)   # leading-dim slice
            acc = acc + jnp.dot(src, w2_ref[kh, kw],
                                preferred_element_type=jnp.float32)
    h2 = jnp.maximum(acc, 0.0)

    # ---- conv3 (1x1) + bn3 + identity residual + relu ----------------------
    y = jnp.dot(h2, w3_ref[...], preferred_element_type=jnp.float32)
    y = y + b3_ref[...] + x2d                          # Cin == Cout (downsample=None)
    o_ref[...] = jnp.maximum(y, 0.0).reshape(1, H, W, Cout)


# ---------------------------------------------------------------------------
# Wrapper
# ---------------------------------------------------------------------------

def bottleneck_forward(x_nchw, p):
    """Pallas implementation of Bottleneck.forward (dcn=None, downsample=None, stride=1)."""
    N, Cin, H, W = x_nchw.shape
    P = p["w1"].shape[1]
    Cout = 4 * P
    assert Cin == Cout, "identity residual requires inplanes == 4*planes"
    assert W % 8 == 0, "W must be a sublane multiple for layout-free reshapes"

    # Fold eval-mode BN scale into the conv weights (free precompute); only a
    # per-channel bias add + relu remains inside the kernel.
    w1 = p["w1"] * p["s1"]                 # (Cin, P)   * (1, P)
    w2 = p["w2"] * p["s2"][0]              # (3,3,P,P)  * (P,)  broadcast on out-ch
    w3 = p["w3"] * p["s3"]                 # (P, Cout)  * (1, Cout)
    b1, b2, b3 = p["b1"], p["b2"], p["b3"]

    # Channels-last so channels live on the lane axis. These two transposes are
    # module-boundary only; in a full NHWC network they disappear.
    x = jnp.transpose(x_nchw, (0, 2, 3, 1))

    flops = 2 * N * H * W * (Cin * P + 9 * P * P + P * Cout)
    bytes_accessed = 4 * (N * H * W * (Cin + Cout)
                          + Cin * P + 9 * P * P + P * Cout + 2 * P + Cout)

    out = pl.pallas_call(
        _bottleneck_fused_kernel,
        out_shape=jax.ShapeDtypeStruct((N, H, W, Cout), jnp.float32),
        grid=(N,),
        in_specs=[
            pl.BlockSpec((1, H, W, Cin), lambda n: (n, 0, 0, 0)),
            pl.BlockSpec((Cin, P), lambda n: (0, 0)),
            pl.BlockSpec((1, P), lambda n: (0, 0)),
            pl.BlockSpec((3, 3, P, P), lambda n: (0, 0, 0, 0)),
            pl.BlockSpec((1, P), lambda n: (0, 0)),
            pl.BlockSpec((P, Cout), lambda n: (0, 0)),
            pl.BlockSpec((1, Cout), lambda n: (0, 0)),
        ],
        out_specs=pl.BlockSpec((1, H, W, Cout), lambda n: (n, 0, 0, 0)),
        scratch_shapes=[pltpu.VMEM((H + 2, W, P), jnp.float32)],
        compiler_params=pltpu.CompilerParams(
            dimension_semantics=("parallel",)),
        cost_estimate=pl.CostEstimate(
            flops=flops, transcendentals=0, bytes_accessed=bytes_accessed),
    )(x, w1, b1, w2, b2, w3, b3)

    return jnp.transpose(out, (0, 3, 1, 2))            # back to NCHW


# ---------------------------------------------------------------------------
# Pure-JAX reference (gold standard for correctness)
# ---------------------------------------------------------------------------

def reference_forward(x_nchw, p):
    x = jnp.transpose(x_nchw, (0, 2, 3, 1))
    dn = ("NHWC", "HWIO", "NHWC")
    conv = lambda a, w, pad: jax.lax.conv_general_dilated(
        a, w, (1, 1), pad, dimension_numbers=dn,
        precision=jax.lax.Precision.HIGHEST)
    o = conv(x, p["w1"][None, None], "VALID")
    o = jnp.maximum(o * p["s1"][0] + p["b1"][0], 0.0)
    o = conv(o, p["w2"], "SAME")
    o = jnp.maximum(o * p["s2"][0] + p["b2"][0], 0.0)
    o = conv(o, p["w3"][None, None], "VALID")
    o = jnp.maximum(o * p["s3"][0] + p["b3"][0] + x, 0.0)
    return jnp.transpose(o, (0, 3, 1, 2))


# ---------------------------------------------------------------------------
# Deterministic parameter construction
# ---------------------------------------------------------------------------

def make_params(key, inplanes, planes):
    ks = jax.random.split(key, 6)

    def bn_fold(k, c):
        kg, kb, km, kv = jax.random.split(k, 4)
        gamma = 1.0 + 0.1 * jax.random.normal(kg, (c,), jnp.float32)
        beta = 0.1 * jax.random.normal(kb, (c,), jnp.float32)
        mean = 0.1 * jax.random.normal(km, (c,), jnp.float32)
        var = 1.0 + 0.1 * jax.random.uniform(kv, (c,), jnp.float32)
        scale = gamma / jnp.sqrt(var + 1e-5)
        bias = beta - mean * scale
        return scale[None, :], bias[None, :]

    w1 = 0.1 * jax.random.normal(ks[0], (inplanes, planes), jnp.float32)
    w2 = 0.1 * jax.random.normal(ks[1], (3, 3, planes, planes), jnp.float32)
    w3 = 0.1 * jax.random.normal(ks[2], (planes, planes * 4), jnp.float32)
    s1, b1 = bn_fold(ks[3], planes)
    s2, b2 = bn_fold(ks[4], planes)
    s3, b3 = bn_fold(ks[5], planes * 4)
    return dict(w1=w1, w2=w2, w3=w3, s1=s1, b1=b1, s2=s2, b2=b2, s3=s3, b3=b3)


if __name__ == "__main__":
    planes = 32
    inplanes = planes * 4            # identity residual add requires inplanes == 4*planes
    N, H, W = 2, 16, 16

    key = jax.random.PRNGKey(0)
    kx, kp = jax.random.split(key)
    x = jax.random.normal(kx, (N, inplanes, H, W), jnp.float32)   # NCHW like PyTorch
    params = make_params(kp, inplanes, planes)

    fwd = jax.jit(bottleneck_forward)
    out = jax.block_until_ready(fwd(x, params))
    ref = jax.block_until_ready(reference_forward(x, params))

    assert out.shape == (N, inplanes, H, W), out.shape
    assert jnp.all(jnp.isfinite(out))
    max_err = float(jnp.max(jnp.abs(out - ref)))
    # Tolerance covers the MXU's default f32 matmul path vs. the HIGHEST-precision
    # XLA reference.
    assert jnp.allclose(out, ref, rtol=3e-2, atol=3e-2), max_err
    print("KERNEL_OK")
</pallas_src>

<mosaic_0001>
module attributes {stable_mosaic.version = 11 : i64} {
  func.func @_bottleneck_fused_kernel(%arg0: i32, %arg1: memref<1x16x16x128xf32, #tpu.memory_space<vmem>>, %arg2: memref<128x32xf32, #tpu.memory_space<vmem>>, %arg3: memref<1x32xf32, #tpu.memory_space<vmem>>, %arg4: memref<3x3x32x32xf32, #tpu.memory_space<vmem>>, %arg5: memref<1x32xf32, #tpu.memory_space<vmem>>, %arg6: memref<32x128xf32, #tpu.memory_space<vmem>>, %arg7: memref<1x128xf32, #tpu.memory_space<vmem>>, %arg8: memref<1x16x16x128xf32, #tpu.memory_space<vmem>>, %arg9: memref<18x16x32xf32, #tpu.memory_space<vmem>>) attributes {dimension_semantics = [#tpu.dimension_semantics<parallel>], iteration_bounds = array<i64: 2>, scalar_prefetch = 0 : i64, scratch_operands = 1 : i64, tpu.core_type = #tpu.core_type<tc>, window_params = [{transform_indices = @transform_0, window_bounds = array<i64: 1, 16, 16, 128>}, {pipeline_mode = #tpu.pipeline_mode<synchronous>, transform_indices = @transform_1, window_bounds = array<i64: 128, 32>}, {pipeline_mode = #tpu.pipeline_mode<synchronous>, transform_indices = @transform_2, window_bounds = array<i64: 1, 32>}, {pipeline_mode = #tpu.pipeline_mode<synchronous>, transform_indices = @transform_3, window_bounds = array<i64: 3, 3, 32, 32>}, {pipeline_mode = #tpu.pipeline_mode<synchronous>, transform_indices = @transform_4, window_bounds = array<i64: 1, 32>}, {pipeline_mode = #tpu.pipeline_mode<synchronous>, transform_indices = @transform_5, window_bounds = array<i64: 32, 128>}, {pipeline_mode = #tpu.pipeline_mode<synchronous>, transform_indices = @transform_6, window_bounds = array<i64: 1, 128>}, {transform_indices = @transform_7, window_bounds = array<i64: 1, 16, 16, 128>}]} {
    %c0 = arith.constant 0 : index
    %c0_0 = arith.constant 0 : index
    %c0_1 = arith.constant 0 : index
    %c0_2 = arith.constant 0 : index
    %0 = vector.load %arg1[%c0, %c0_0, %c0_1, %c0_2] : memref<1x16x16x128xf32, #tpu.memory_space<vmem>>, vector<1x16x16x128xf32>
    %1 = vector.shape_cast %0 : vector<1x16x16x128xf32> to vector<256x128xf32>
    %c0_3 = arith.constant 0 : index
    %c0_4 = arith.constant 0 : index
    %2 = vector.load %arg2[%c0_3, %c0_4] : memref<128x32xf32, #tpu.memory_space<vmem>>, vector<128x32xf32>
    %cst = arith.constant dense<0.000000e+00> : vector<256x32xf32>
    %3 = tpu.matmul %1, %2, %cst {dimension_numbers = #tpu.dot_dimension_numbers<[1], [0], [0], [1], [0, 0, 1, 1], [], []>} : vector<256x128xf32>, vector<128x32xf32>, vector<256x32xf32> -> vector<256x32xf32>
    %c0_5 = arith.constant 0 : index
    %c0_6 = arith.constant 0 : index
    %4 = vector.load %arg3[%c0_5, %c0_6] : memref<1x32xf32, #tpu.memory_space<vmem>>, vector<1x32xf32>
    %5 = vector.broadcast %4 : vector<1x32xf32> to vector<256x32xf32>
    %6 = arith.addf %3, %5 : vector<256x32xf32>
    %cst_7 = arith.constant 0.000000e+00 : f32
    %7 = vector.broadcast %cst_7 : f32 to vector<256x32xf32>
    %8 = arith.maximumf %6, %7 : vector<256x32xf32>
    %cst_8 = arith.constant 0.000000e+00 : f32
    %9 = vector.broadcast %cst_8 : f32 to vector<16x32xf32>
    %c0_9 = arith.constant 0 : index
    %c0_10 = arith.constant 0 : index
    %c0_11 = arith.constant 0 : index
    %10 = vector.load %arg9[%c0_9, %c0_10, %c0_11] : memref<18x16x32xf32, #tpu.memory_space<vmem>>, vector<1x16x32xf32>
    %11 = vector.shape_cast %10 : vector<1x16x32xf32> to vector<16x32xf32>
    %12 = vector.shape_cast %9 : vector<16x32xf32> to vector<1x16x32xf32>
    tpu.vector_store %arg9[%c0_9, %c0_10, %c0_11], %12 {strides = array<i32>} : memref<18x16x32xf32, #tpu.memory_space<vmem>>, vector<1x16x32xf32>,
    %cst_12 = arith.constant 0.000000e+00 : f32
    %13 = vector.broadcast %cst_12 : f32 to vector<16x32xf32>
    %c17 = arith.constant 17 : index
    %c0_13 = arith.constant 0 : index
    %c0_14 = arith.constant 0 : index
    %14 = vector.load %arg9[%c17, %c0_13, %c0_14] : memref<18x16x32xf32, #tpu.memory_space<vmem>>, vector<1x16x32xf32>
    %15 = vector.shape_cast %14 : vector<1x16x32xf32> to vector<16x32xf32>
    %16 = vector.shape_cast %13 : vector<16x32xf32> to vector<1x16x32xf32>
    tpu.vector_store %arg9[%c17, %c0_13, %c0_14], %16 {strides = array<i32>} : memref<18x16x32xf32, #tpu.memory_space<vmem>>, vector<1x16x32xf32>,
    %17 = vector.shape_cast %8 : vector<256x32xf32> to vector<16x16x32xf32>
    %c1 = arith.constant 1 : index
    %c0_15 = arith.constant 0 : index
    %c0_16 = arith.constant 0 : index
    %18 = vector.load %arg9[%c1, %c0_15, %c0_16] : memref<18x16x32xf32, #tpu.memory_space<vmem>>, vector<16x16x32xf32>
    tpu.vector_store %arg9[%c1, %c0_15, %c0_16], %17 {strides = array<i32>} : memref<18x16x32xf32, #tpu.memory_space<vmem>>, vector<16x16x32xf32>,
    %c0_17 = arith.constant 0 : index
    %c0_18 = arith.constant 0 : index
    %c0_19 = arith.constant 0 : index
    %19 = vector.load %arg9[%c0_17, %c0_18, %c0_19] : memref<18x16x32xf32, #tpu.memory_space<vmem>>, vector<18x16x32xf32>
    %20 = tpu.iota {dimensions = array<i32: 1>} : vector<18x16x32xi32>
    %c15_i32 = arith.constant 15 : i32
    %21 = vector.broadcast %c15_i32 : i32 to vector<18x16x32xi32>
    %22 = arith.cmpi eq, %20, %21 : vector<18x16x32xi32>
    %c15_i32_20 = arith.constant 15 : i32
    %23 = tpu.dynamic_rotate %19 by %c15_i32_20 dim 1 : vector<18x16x32xf32>, i32 -> vector<18x16x32xf32>
    %cst_21 = arith.constant 0.000000e+00 : f32
    %24 = vector.broadcast %cst_21 : f32 to vector<18x16x32xf32>
    %25 = arith.select %22, %24, %23 : vector<18x16x32xi1>, vector<18x16x32xf32>
    %c0_i32 = arith.constant 0 : i32
    %26 = vector.broadcast %c0_i32 : i32 to vector<18x16x32xi32>
    %27 = arith.cmpi eq, %20, %26 : vector<18x16x32xi32>
    %c1_i32 = arith.constant 1 : i32
    %28 = tpu.dynamic_rotate %19 by %c1_i32 dim 1 : vector<18x16x32xf32>, i32 -> vector<18x16x32xf32>
    %cst_22 = arith.constant 0.000000e+00 : f32
    %29 = vector.broadcast %cst_22 : f32 to vector<18x16x32xf32>
    %30 = arith.select %27, %29, %28 : vector<18x16x32xi1>, vector<18x16x32xf32>
    %c0_23 = arith.constant 0 : index
    %c0_24 = arith.constant 0 : index
    %31 = vector.load %arg5[%c0_23, %c0_24] : memref<1x32xf32, #tpu.memory_space<vmem>>, vector<1x32xf32>
    %32 = vector.shape_cast %31 : vector<1x32xf32> to vector<1x32xf32>
    %33 = vector.broadcast %32 : vector<1x32xf32> to vector<256x32xf32>
    %34 = vector.extract_strided_slice %30 {offsets = [0, 0, 0], sizes = [16, 16, 32], strides = [1, 1, 1]} : vector<18x16x32xf32> to vector<16x16x32xf32>
    %35 = vector.shape_cast %34 : vector<16x16x32xf32> to vector<256x32xf32>
    %c0_25 = arith.constant 0 : index
    %c0_26 = arith.constant 0 : index
    %c0_27 = arith.constant 0 : index
    %c0_28 = arith.constant 0 : index
    %36 = vector.load %arg4[%c0_25, %c0_26, %c0_27, %c0_28] : memref<3x3x32x32xf32, #tpu.memory_space<vmem>>, vector<1x1x32x32xf32>
    %37 = vector.shape_cast %36 : vector<1x1x32x32xf32> to vector<32x32xf32>
    %cst_29 = arith.constant dense<0.000000e+00> : vector<256x32xf32>
    %38 = tpu.matmul %35, %37, %cst_29 {dimension_numbers = #tpu.dot_dimension_numbers<[1], [0], [0], [1], [0, 0, 1, 1], [], []>} : vector<256x32xf32>, vector<32x32xf32>, vector<256x32xf32> -> vector<256x32xf32>
    %39 = arith.addf %33, %38 : vector<256x32xf32>
    %40 = vector.extract_strided_slice %19 {offsets = [0, 0, 0], sizes = [16, 16, 32], strides = [1, 1, 1]} : vector<18x16x32xf32> to vector<16x16x32xf32>
    %41 = vector.shape_cast %40 : vector<16x16x32xf32> to vector<256x32xf32>
    %c0_30 = arith.constant 0 : index
    %c1_31 = arith.constant 1 : index
    %c0_32 = arith.constant 0 : index
    %c0_33 = arith.constant 0 : index
    %42 = vector.load %arg4[%c0_30, %c1_31, %c0_32, %c0_33] : memref<3x3x32x32xf32, #tpu.memory_space<vmem>>, vector<1x1x32x32xf32>
    %43 = vector.shape_cast %42 : vector<1x1x32x32xf32> to vector<32x32xf32>
    %cst_34 = arith.constant dense<0.000000e+00> : vector<256x32xf32>
    %44 = tpu.matmul %41, %43, %cst_34 {dimension_numbers = #tpu.dot_dimension_numbers<[1], [0], [0], [1], [0, 0, 1, 1], [], []>} : vector<256x32xf32>, vector<32x32xf32>, vector<256x32xf32> -> vector<256x32xf32>
    %45 = arith.addf %39, %44 : vector<256x32xf32>
    %46 = vector.extract_strided_slice %25 {offsets = [0, 0, 0], sizes = [16, 16, 32], strides = [1, 1, 1]} : vector<18x16x32xf32> to vector<16x16x32xf32>
    %47 = vector.shape_cast %46 : vector<16x16x32xf32> to vector<256x32xf32>
    %c0_35 = arith.constant 0 : index
    %c2 = arith.constant 2 : index
    %c0_36 = arith.constant 0 : index
    %c0_37 = arith.constant 0 : index
    %48 = vector.load %arg4[%c0_35, %c2, %c0_36, %c0_37] : memref<3x3x32x32xf32, #tpu.memory_space<vmem>>, vector<1x1x32x32xf32>
    %49 = vector.shape_cast %48 : vector<1x1x32x32xf32> to vector<32x32xf32>
    %cst_38 = arith.constant dense<0.000000e+00> : vector<256x32xf32>
    %50 = tpu.matmul %47, %49, %cst_38 {dimension_numbers = #tpu.dot_dimension_numbers<[1], [0], [0], [1], [0, 0, 1, 1], [], []>} : vector<256x32xf32>, vector<32x32xf32>, vector<256x32xf32> -> vector<256x32xf32>
    %51 = arith.addf %45, %50 : vector<256x32xf32>
    %52 = vector.extract_strided_slice %30 {offsets = [1, 0, 0], sizes = [16, 16, 32], strides = [1, 1, 1]} : vector<18x16x32xf32> to vector<16x16x32xf32>
    %53 = vector.shape_cast %52 : vector<16x16x32xf32> to vector<256x32xf32>
    %c1_39 = arith.constant 1 : index
    %c0_40 = arith.constant 0 : index
    %c0_41 = arith.constant 0 : index
    %c0_42 = arith.constant 0 : index
    %54 = vector.load %arg4[%c1_39, %c0_40, %c0_41, %c0_42] : memref<3x3x32x32xf32, #tpu.memory_space<vmem>>, vector<1x1x32x32xf32>
    %55 = vector.shape_cast %54 : vector<1x1x32x32xf32> to vector<32x32xf32>
    %cst_43 = arith.constant dense<0.000000e+00> : vector<256x32xf32>
    %56 = tpu.matmul %53, %55, %cst_43 {dimension_numbers = #tpu.dot_dimension_numbers<[1], [0], [0], [1], [0, 0, 1, 1], [], []>} : vector<256x32xf32>, vector<32x32xf32>, vector<256x32xf32> -> vector<256x32xf32>
    %57 = arith.addf %51, %56 : vector<256x32xf32>
    %58 = vector.extract_strided_slice %19 {offsets = [1, 0, 0], sizes = [16, 16, 32], strides = [1, 1, 1]} : vector<18x16x32xf32> to vector<16x16x32xf32>
    %59 = vector.shape_cast %58 : vector<16x16x32xf32> to vector<256x32xf32>
    %c1_44 = arith.constant 1 : index
    %c1_45 = arith.constant 1 : index
    %c0_46 = arith.constant 0 : index
    %c0_47 = arith.constant 0 : index
    %60 = vector.load %arg4[%c1_44, %c1_45, %c0_46, %c0_47] : memref<3x3x32x32xf32, #tpu.memory_space<vmem>>, vector<1x1x32x32xf32>
    %61 = vector.shape_cast %60 : vector<1x1x32x32xf32> to vector<32x32xf32>
    %cst_48 = arith.constant dense<0.000000e+00> : vector<256x32xf32>
    %62 = tpu.matmul %59, %61, %cst_48 {dimension_numbers = #tpu.dot_dimension_numbers<[1], [0], [0], [1], [0, 0, 1, 1], [], []>} : vector<256x32xf32>, vector<32x32xf32>, vector<256x32xf32> -> vector<256x32xf32>
    %63 = arith.addf %57, %62 : vector<256x32xf32>
    %64 = vector.extract_strided_slice %25 {offsets = [1, 0, 0], sizes = [16, 16, 32], strides = [1, 1, 1]} : vector<18x16x32xf32> to vector<16x16x32xf32>
    %65 = vector.shape_cast %64 : vector<16x16x32xf32> to vector<256x32xf32>
    %c1_49 = arith.constant 1 : index
    %c2_50 = arith.constant 2 : index
    %c0_51 = arith.constant 0 : index
    %c0_52 = arith.constant 0 : index
    %66 = vector.load %arg4[%c1_49, %c2_50, %c0_51, %c0_52] : memref<3x3x32x32xf32, #tpu.memory_space<vmem>>, vector<1x1x32x32xf32>
    %67 = vector.shape_cast %66 : vector<1x1x32x32xf32> to vector<32x32xf32>
    %cst_53 = arith.constant dense<0.000000e+00> : vector<256x32xf32>
    %68 = tpu.matmul %65, %67, %cst_53 {dimension_numbers = #tpu.dot_dimension_numbers<[1], [0], [0], [1], [0, 0, 1, 1], [], []>} : vector<256x32xf32>, vector<32x32xf32>, vector<256x32xf32> -> vector<256x32xf32>
    %69 = arith.addf %63, %68 : vector<256x32xf32>
    %70 = vector.extract_strided_slice %30 {offsets = [2, 0, 0], sizes = [16, 16, 32], strides = [1, 1, 1]} : vector<18x16x32xf32> to vector<16x16x32xf32>
    %71 = vector.shape_cast %70 : vector<16x16x32xf32> to vector<256x32xf32>
    %c2_54 = arith.constant 2 : index
    %c0_55 = arith.constant 0 : index
    %c0_56 = arith.constant 0 : index
    %c0_57 = arith.constant 0 : index
    %72 = vector.load %arg4[%c2_54, %c0_55, %c0_56, %c0_57] : memref<3x3x32x32xf32, #tpu.memory_space<vmem>>, vector<1x1x32x32xf32>
    %73 = vector.shape_cast %72 : vector<1x1x32x32xf32> to vector<32x32xf32>
    %cst_58 = arith.constant dense<0.000000e+00> : vector<256x32xf32>
    %74 = tpu.matmul %71, %73, %cst_58 {dimension_numbers = #tpu.dot_dimension_numbers<[1], [0], [0], [1], [0, 0, 1, 1], [], []>} : vector<256x32xf32>, vector<32x32xf32>, vector<256x32xf32> -> vector<256x32xf32>
    %75 = arith.addf %69, %74 : vector<256x32xf32>
    %76 = vector.extract_strided_slice %19 {offsets = [2, 0, 0], sizes = [16, 16, 32], strides = [1, 1, 1]} : vector<18x16x32xf32> to vector<16x16x32xf32>
    %77 = vector.shape_cast %76 : vector<16x16x32xf32> to vector<256x32xf32>
    %c2_59 = arith.constant 2 : index
    %c1_60 = arith.constant 1 : index
    %c0_61 = arith.constant 0 : index
    %c0_62 = arith.constant 0 : index
    %78 = vector.load %arg4[%c2_59, %c1_60, %c0_61, %c0_62] : memref<3x3x32x32xf32, #tpu.memory_space<vmem>>, vector<1x1x32x32xf32>
    %79 = vector.shape_cast %78 : vector<1x1x32x32xf32> to vector<32x32xf32>
    %cst_63 = arith.constant dense<0.000000e+00> : vector<256x32xf32>
    %80 = tpu.matmul %77, %79, %cst_63 {dimension_numbers = #tpu.dot_dimension_numbers<[1], [0], [0], [1], [0, 0, 1, 1], [], []>} : vector<256x32xf32>, vector<32x32xf32>, vector<256x32xf32> -> vector<256x32xf32>
    %81 = arith.addf %75, %80 : vector<256x32xf32>
    %82 = vector.extract_strided_slice %25 {offsets = [2, 0, 0], sizes = [16, 16, 32], strides = [1, 1, 1]} : vector<18x16x32xf32> to vector<16x16x32xf32>
    %83 = vector.shape_cast %82 : vector<16x16x32xf32> to vector<256x32xf32>
    %c2_64 = arith.constant 2 : index
    %c2_65 = arith.constant 2 : index
    %c0_66 = arith.constant 0 : index
    %c0_67 = arith.constant 0 : index
    %84 = vector.load %arg4[%c2_64, %c2_65, %c0_66, %c0_67] : memref<3x3x32x32xf32, #tpu.memory_space<vmem>>, vector<1x1x32x32xf32>
    %85 = vector.shape_cast %84 : vector<1x1x32x32xf32> to vector<32x32xf32>
    %cst_68 = arith.constant dense<0.000000e+00> : vector<256x32xf32>
    %86 = tpu.matmul %83, %85, %cst_68 {dimension_numbers = #tpu.dot_dimension_numbers<[1], [0], [0], [1], [0, 0, 1, 1], [], []>} : vector<256x32xf32>, vector<32x32xf32>, vector<256x32xf32> -> vector<256x32xf32>
    %87 = arith.addf %81, %86 : vector<256x32xf32>
    %cst_69 = arith.constant 0.000000e+00 : f32
    %88 = vector.broadcast %cst_69 : f32 to vector<256x32xf32>
    %89 = arith.maximumf %87, %88 : vector<256x32xf32>
    %c0_70 = arith.constant 0 : index
    %c0_71 = arith.constant 0 : index
    %90 = vector.load %arg6[%c0_70, %c0_71] : memref<32x128xf32, #tpu.memory_space<vmem>>, vector<32x128xf32>
    %cst_72 = arith.constant dense<0.000000e+00> : vector<256x128xf32>
    %91 = tpu.matmul %89, %90, %cst_72 {dimension_numbers = #tpu.dot_dimension_numbers<[1], [0], [0], [1], [0, 0, 1, 1], [], []>} : vector<256x32xf32>, vector<32x128xf32>, vector<256x128xf32> -> vector<256x128xf32>
    %c0_73 = arith.constant 0 : index
    %c0_74 = arith.constant 0 : index
    %92 = vector.load %arg7[%c0_73, %c0_74] : memref<1x128xf32, #tpu.memory_space<vmem>>, vector<1x128xf32>
    %93 = vector.broadcast %92 : vector<1x128xf32> to vector<256x128xf32>
    %94 = arith.addf %91, %93 : vector<256x128xf32>
    %95 = arith.addf %94, %1 : vector<256x128xf32>
    %cst_75 = arith.constant 0.000000e+00 : f32
    %96 = vector.broadcast %cst_75 : f32 to vector<256x128xf32>
    %97 = arith.maximumf %95, %96 : vector<256x128xf32>
    %98 = vector.shape_cast %97 : vector<256x128xf32> to vector<1x16x16x128xf32>
    %c0_76 = arith.constant 0 : index
    %c0_77 = arith.constant 0 : index
    %c0_78 = arith.constant 0 : index
    %c0_79 = arith.constant 0 : index
    %99 = vector.load %arg8[%c0_76, %c0_77, %c0_78, %c0_79] : memref<1x16x16x128xf32, #tpu.memory_space<vmem>>, vector<1x16x16x128xf32>
    tpu.vector_store %arg8[%c0_76, %c0_77, %c0_78, %c0_79], %98 {strides = array<i32>} : memref<1x16x16x128xf32, #tpu.memory_space<vmem>>, vector<1x16x16x128xf32>,
    return
  }
  func.func @transform_0(%arg0: i32) -> (i32, i32, i32, i32) {
    %c0_i32 = arith.constant 0 : i32
    %c0_i32_0 = arith.constant 0 : i32
    %c0_i32_1 = arith.constant 0 : i32
    %c0_i32_2 = arith.constant 0 : i32
    return %arg0, %c0_i32, %c0_i32_0, %c0_i32_1 : i32, i32, i32, i32
  }
  func.func @transform_1(%arg0: i32) -> (i32, i32) {
    %c0_i32 = arith.constant 0 : i32
    %c0_i32_0 = arith.constant 0 : i32
    %c0_i32_1 = arith.constant 0 : i32
    return %c0_i32, %c0_i32_0 : i32, i32
  }
  func.func @transform_2(%arg0: i32) -> (i32, i32) {
    %c0_i32 = arith.constant 0 : i32
    %c0_i32_0 = arith.constant 0 : i32
    %c0_i32_1 = arith.constant 0 : i32
    return %c0_i32, %c0_i32_0 : i32, i32
  }
  func.func @transform_3(%arg0: i32) -> (i32, i32, i32, i32) {
    %c0_i32 = arith.constant 0 : i32
    %c0_i32_0 = arith.constant 0 : i32
    %c0_i32_1 = arith.constant 0 : i32
    %c0_i32_2 = arith.constant 0 : i32
    %c0_i32_3 = arith.constant 0 : i32
    return %c0_i32, %c0_i32_0, %c0_i32_1, %c0_i32_2 : i32, i32, i32, i32
  }
  func.func @transform_4(%arg0: i32) -> (i32, i32) {
    %c0_i32 = arith.constant 0 : i32
    %c0_i32_0 = arith.constant 0 : i32
    %c0_i32_1 = arith.constant 0 : i32
    return %c0_i32, %c0_i32_0 : i32, i32
  }
  func.func @transform_5(%arg0: i32) -> (i32, i32) {
    %c0_i32 = arith.constant 0 : i32
    %c0_i32_0 = arith.constant 0 : i32
    %c0_i32_1 = arith.constant 0 : i32
    return %c0_i32, %c0_i32_0 : i32, i32
  }
  func.func @transform_6(%arg0: i32) -> (i32, i32) {
    %c0_i32 = arith.constant 0 : i32
    %c0_i32_0 = arith.constant 0 : i32
    %c0_i32_1 = arith.constant 0 : i32
    return %c0_i32, %c0_i32_0 : i32, i32
  }
  func.func @transform_7(%arg0: i32) -> (i32, i32, i32, i32) {
    %c0_i32 = arith.constant 0 : i32
    %c0_i32_0 = arith.constant 0 : i32
    %c0_i32_1 = arith.constant 0 : i32
    %c0_i32_2 = arith.constant 0 : i32
    return %arg0, %c0_i32, %c0_i32_0, %c0_i32_1 : i32, i32, i32, i32
  }
}

</mosaic_0001>

<bundles_post_ra>
// kernel: bottleneck_forward.1
= control target key start
LH: loop header
LB: loop body
LE: loop exit
PB: predicated region body
PF: predicated region fallthrough
CT: control target
= control target key end

     0   :  { %12 = vsyncpa [#allocation4], 0  ;;  %s7826_s0 = inlined_call_operand.vmem [shape: f32[2,16,16,128], index: 0, kind: input, shape index: {}]   ;;  %s7827_s1 = inlined_call_operand.vmem [shape: f32[128,32], index: 1, kind: input, shape index: {}]   ;;  %s7828_s2 = inlined_call_operand.vmem [shape: f32[1,32], index: 2, kind: input, shape index: {}]   ;;  %s7829_s3 = inlined_call_operand.vmem [shape: f32[3,3,32,32], index: 3, kind: input, shape index: {}]   ;;  %s7830_s4 = inlined_call_operand.vmem [shape: f32[1,32], index: 4, kind: input, shape index: {}]   ;;  %s7831_s5 = inlined_call_operand.vmem [shape: f32[32,128], index: 5, kind: input, shape index: {}]   ;;  %s7832_s6 = inlined_call_operand.vmem [shape: f32[1,128], index: 6, kind: input, shape index: {}]   ;;  %s7833_s7 = inlined_call_operand.hbm [shape: f32[2,16,16,128], index: 7, kind: output, shape index: {}]  }
   0x1   :  { %14 = vsyncpa [#allocation4 + $0x1], 0  ;;  %s6126_s24 = smov 0   ;;  %s6128_s25 = smov 0  }
   0x2   :  { %s6130_s26 = smov 0   ;;  %s6132_s27 = smov 0  }
   0x3 LB: > { %s6147_s28 = sadd.s32 4294967295, %s6080_s27   ;;  %s4113_s29 = sadd.s32 4294967294, %s6080_s27   ;;  %s6080_s27 = sphi %s6132_s27, %s7917_s27   ;;  %s6076_s26 = sphi %s6130_s26, %s7916_s26   ;;  %s6072_s25 = sphi %s6128_s25, %s7915_s25   ;;  %s6068_s24 = sphi %s6126_s24, %s7914_s24  }
   0x4   : > { %s6151_s30 = sadd.s32 1, %s6080_s27   ;;  %s179_s8 = sadd.s32 1, %s6076_s26 }
   0x5   : > { %s176_s9 = ssub.s32 %s6080_s27, %s6151_s30  ;;  %p189_p0 = scmp.ne.s32.totalorder %s6076_s26, %s6072_s25 }
   0x6   : > { %p177_p1 = scmp.eq.s32.totalorder %s176_s9, 0  ;;  %p190_p2 = scmp.eq.s32.totalorder %s6147_s28, 1 }
   0x7   : > { %p195_p3 = scmp.ne.s32.totalorder %s6072_s25, %s6068_s24  ;;  %p196_p4 = scmp.eq.s32.totalorder %s4113_s29, 1 }
   0x8   : > { %s6162_s10 = scalar_select %p177_p1, %s6076_s26, %s179_s8  }
   0x9   : > { %p6164_p5 = por %p190_p2, %p189_p0  ;;  %p6168_p6 = por %p196_p4, %p195_p3 }
   0xa   : > { %p4116_p7 = scmp.ge.s32.totalorder %s6080_s27, 1  ;;  %p240_p8 = scmp.lt.s32.totalorder %s6080_s27, 3 }
   0xc   : > { %p241_p9 = pnand %p4116_p7, %p240_p8 }
   0xe   : > { %244 = sbr.rel (%p241_p9) target bundleno = 1118 (0x45e), region = 48 }
  0x15   : > { %v309_v0 = vld [vmem:[%s7827_s1] sm:$0xff]  ;;  %v310_v1 = vld [vmem:[%s7827_s1 + $0x8] sm:$0xff]  ;;  %v311_v2 = vld [vmem:[%s7827_s1 + $0x10] sm:$0xff]  ;;  %p272_p10 = scmp.lt.s32.totalorder %s6147_s28, 1  ;;  %vm589_vm0 = vcmask 261120   ;;  %v6082_v56 = vmov 0.0   ;;  %v664_v60 = vlaneseq }
  0x16   : > { %v5530_v3 = vpack.c.bf16 %v310_v1, %v309_v0  ;;  %v312_v4 = vld [vmem:[%s7827_s1 + $0x18] sm:$0xff]  ;;  %v313_v6 = vld [vmem:[%s7827_s1 + $0x20] sm:$0xff]  ;;  %v314_v7 = vld [vmem:[%s7827_s1 + $0x28] sm:$0xff]  ;;  %590 = vst.msk [vmem:[#allocation2] sm:$0xff] %vm589_vm0, %v6082_v56  ;;  %s269_s16 = sand.u32 1, %s6072_s25   ;;  %s4481_s21 = sshll.u32 %s6147_s28, 12 }
  0x17   : > { %v5534_v5 = vpack.c.bf16 %v312_v4, %v311_v2  ;;  %s273_s8 = scalar_select %p272_p10, %s6147_s28, 1  ;;  %v5538_v8 = vpack.c.bf16 %v314_v7, %v313_v6  ;;  %v315_v9 = vld [vmem:[%s7827_s1 + $0x30] sm:$0xff]  ;;  %v316_v10 = vld [vmem:[%s7827_s1 + $0x38] sm:$0xff]  ;;  %v317_v13 = vld [vmem:[%s7827_s1 + $0x40] sm:$0xff]  ;;  %591 = vst.msk [vmem:[#allocation2 + $0x8] sm:$0xff] %vm589_vm0, %v6082_v56  ;;  %v6281_v2 = vshrl.u32 %v664_v60, 7 }
  0x18   : > { %5531 = vmatprep.subr.bf16.mxu0 %v5530_v3  ;;  %v5542_v12 = vpack.c.bf16 %v316_v10, %v315_v9  ;;  %v318_v14 = vld [vmem:[%s7827_s1 + $0x48] sm:$0xff]  ;;  %v319_v16 = vld [vmem:[%s7827_s1 + $0x50] sm:$0xff]  ;;  %v320_v17 = vld [vmem:[%s7827_s1 + $0x58] sm:$0xff]  ;;  %593 = vst.msk [vmem:[#allocation2 + $0x110] sm:$0xff] %vm589_vm0, %v6082_v56  ;;  %s4117_s19 = sshll.u32 %s269_s16, 8  ;;  %s7785_s28 = scalar_lea.sflag [#allocation4], %s269_s16 }
  0x19   : > { %5533 = vmatpush3.bf16.msra.mxu0 %v5530_v3  ;;  %s4480_s9 = sshll.u32 %s273_s8, 8  ;;  %v5546_v15 = vpack.c.bf16 %v318_v14, %v317_v13  ;;  %v5550_v18 = vpack.c.bf16 %v320_v17, %v319_v16  ;;  %v321_v19 = vld [vmem:[%s7827_s1 + $0x60] sm:$0xff]  ;;  %v322_v20 = vld [vmem:[%s7827_s1 + $0x68] sm:$0xff]  ;;  %v323_v22 = vld [vmem:[%s7827_s1 + $0x70] sm:$0xff]  ;;  %594 = vst.msk [vmem:[#allocation2 + $0x118] sm:$0xff] %vm589_vm0, %v6082_v56  ;;  %vm816_vm1 = vcmp.lt.s32.totalorder %v6281_v2, 1  ;;  %s7777_s8 = scalar_lea.hbm %s7833_s7, %s4481_s21 }
  0x1a   : > { %5535 = vmatprep.subr.bf16.mxu0 %v5534_v5  ;;  %s6197_s15 = scalar_lea.vmem %s7826_s0, %s4480_s9  ;;  %v5554_v21 = vpack.c.bf16 %v322_v20, %v321_v19  ;;  %v324_v23 = vld [vmem:[%s7827_s1 + $0x78] sm:$0xff]  ;;  %v896_v57 = vld [vmem:[%s7829_s3] sm:$0xff]  ;;  %v897_v58 = vld [vmem:[%s7829_s3 + $0x8] sm:$0xff]  ;;  %vm778_vm2 = vcmp.eq.s32.totalorder %v6281_v2, 0  ;;  %vm705_vm3 = vcmp.lt.s32.totalorder %v6281_v2, 7  ;;  %s7682_s20 = scalar_lea.vmem [#allocation3], %s4117_s19 }
  0x1b   : > { %v277_v11 = vld [vmem:[%s6197_s15] sm:$0xff]  ;;  %v5558_v24 = vpack.c.bf16 %v324_v23, %v323_v22  ;;  %v278_v25 = vld [vmem:[%s6197_s15 + $0x8] sm:$0xff]  ;;  %v279_v26 = vld [vmem:[%s6197_s15 + $0x10] sm:$0xff]  ;;  %v5562_v59 = vpack.c.bf16 %v897_v58, %v896_v57  ;;  %s4051_s22 = sshll.u32 %s7682_s20, 4  ;;  %s7779_s22 = int_to_ptr.vmem [resolvable:$true] %s4051_s22 }
  0x1c   : > { %4922 = vmatprep.mubr.f32.mxu0 %v277_v11  ;;  %v280_v27 = vld [vmem:[%s6197_s15 + $0x18] sm:$0xff]  ;;  %v281_v28 = vld [vmem:[%s6197_s15 + $0x20] sm:$0xff]  ;;  %v282_v29 = vld [vmem:[%s6197_s15 + $0x28] sm:$0xff]  ;;  %s6018_s9 = scalar_lea.vmem %s7779_s22, 4096 }
  0x1d   : > { %5537 = vmatpush3.bf16.msra.mxu0 %v5534_v5  ;;  %v283_v30 = vld [vmem:[%s6197_s15 + $0x30] sm:$0xff]  ;;  %v284_v31 = vld [vmem:[%s6197_s15 + $0x38] sm:$0xff]  ;;  %v285_v32 = vld [vmem:[%s6197_s15 + $0x40] sm:$0xff]  ;;  %p6019_p11 = scmp.ne.s32.totalorder %s7779_s22, %s6018_s9 }
  0x1e   : > { %5539 = vmatprep.subr.bf16.mxu0 %v5538_v8  ;;  %v286_v33 = vld [vmem:[%s6197_s15 + $0x48] sm:$0xff]  ;;  %v287_v34 = vld [vmem:[%s6197_s15 + $0x50] sm:$0xff]  ;;  %v288_v35 = vld [vmem:[%s6197_s15 + $0x58] sm:$0xff] }
  0x1f   : > { %v289_v36 = vld [vmem:[%s6197_s15 + $0x60] sm:$0xff]  ;;  %v290_v37 = vld [vmem:[%s6197_s15 + $0x68] sm:$0xff]  ;;  %v291_v38 = vld [vmem:[%s6197_s15 + $0x70] sm:$0xff]  ;;  %p6020_p12 = pnand %p6019_p11, %p6164_p5 }
  0x20   : > { %v292_v39 = vld [vmem:[%s6197_s15 + $0x78] sm:$0xff]  ;;  %v293_v40 = vld [vmem:[%s6197_s15 + $0x80] sm:$0xff]  ;;  %v294_v41 = vld [vmem:[%s6197_s15 + $0x88] sm:$0xff] }
  0x21   : > { %5541 = vmatpush3.bf16.msra.mxu0 %v5538_v8  ;;  %v295_v42 = vld [vmem:[%s6197_s15 + $0x90] sm:$0xff]  ;;  %v296_v43 = vld [vmem:[%s6197_s15 + $0x98] sm:$0xff]  ;;  %v297_v44 = vld [vmem:[%s6197_s15 + $0xa0] sm:$0xff]  ;;  %p6021_p13 = pneg %p6020_p12 }
  0x22   : > { %5543 = vmatprep.subr.bf16.mxu0 %v5542_v12  ;;  %v298_v45 = vld [vmem:[%s6197_s15 + $0xa8] sm:$0xff]  ;;  %v299_v46 = vld [vmem:[%s6197_s15 + $0xb0] sm:$0xff]  ;;  %v300_v47 = vld [vmem:[%s6197_s15 + $0xb8] sm:$0xff] }
  0x23   : > { %v301_v48 = vld [vmem:[%s6197_s15 + $0xc0] sm:$0xff]  ;;  %v302_v49 = vld [vmem:[%s6197_s15 + $0xc8] sm:$0xff]  ;;  %v303_v50 = vld [vmem:[%s6197_s15 + $0xd0] sm:$0xff] }
  0x24   : > { %v304_v51 = vld [vmem:[%s6197_s15 + $0xd8] sm:$0xff]  ;;  %v305_v52 = vld [vmem:[%s6197_s15 + $0xe0] sm:$0xff]  ;;  %v306_v53 = vld [vmem:[%s6197_s15 + $0xe8] sm:$0xff] }
  0x25   : > { %5545 = vmatpush3.bf16.msra.mxu0 %v5542_v12  ;;  %v307_v54 = vld [vmem:[%s6197_s15 + $0xf0] sm:$0xff]  ;;  %v308_v55 = vld [vmem:[%s6197_s15 + $0xf8] sm:$0xff]  ;;  %v6277_v0 = vld [vmem:[#allocation2] sm:$0xff] }
  0x26   : > { %5547 = vmatprep.subr.bf16.mxu0 %v5546_v15  ;;  %v898_v61 = vld [vmem:[%s7829_s3 + $0x10] sm:$0xff]  ;;  %v899_v62 = vld [vmem:[%s7829_s3 + $0x18] sm:$0xff]  ;;  %v6279_v1 = vld [vmem:[#allocation2 + $0x8] sm:$0xff]  ;;  %v780_v3 = vrot.slane %v6277_v0, 7 }
  0x27   : > { %v5566_v63 = vpack.c.bf16 %v899_v62, %v898_v61  ;;  %v798_v4 = vrot.slane %v6279_v1, 7  ;;  %v4226_v8 = vld [vmem:[%s7829_s3 + $0x60] sm:$0xff]  ;;  %v4227_v9 = vld [vmem:[%s7829_s3 + $0x68] sm:$0xff]  ;;  %v4228_v11 = vld [vmem:[%s7829_s3 + $0x70] sm:$0xff] }
  0x28   : > { %v6301_v10 = vpack.c.bf16 %v4227_v9, %v4226_v8  ;;  %v4229_v12 = vld [vmem:[%s7829_s3 + $0x78] sm:$0xff]  ;;  %v4262_v14 = vld [vmem:[%s7829_s3 + $0x80] sm:$0xff]  ;;  %v4156_v20 = vld [vmem:[%s7829_s3 + $0x30] sm:$0xff] }
  0x29   : > { %5549 = vmatpush3.bf16.msra.mxu0 %v5546_v15  ;;  %v835_v5 = vsel %vm816_vm1, %v798_v4, %v780_v3  ;;  %v817_v7 = vsel %vm816_vm1, %v780_v3, %v798_v4  ;;  %v6311_v13 = vpack.c.bf16 %v4229_v12, %v4228_v11  ;;  %v4263_v15 = vld [vmem:[%s7829_s3 + $0x88] sm:$0xff]  ;;  %v4154_v17 = vld [vmem:[%s7829_s3 + $0x20] sm:$0xff] }
  0x2a   : > { %5551 = vmatprep.subr.bf16.mxu0 %v5550_v18  ;;  %v853_v6 = vsel %vm778_vm2, 0.0, %v835_v5  ;;  %5642 = vmatprep.subr.bf16.mxu1 %v6301_v10  ;;  %v6321_v16 = vpack.c.bf16 %v4263_v15, %v4262_v14  ;;  %v6339_v23 = vld [vmem:[%s7828_s2] ss:$0 sm:$0xff] }
  0x2b   : > { %5644 = vmatpush3.bf16.msra.mxu1 %v6301_v10 }
  0x2c   : > { %5643 = vmatprep.subr.bf16.mxu1 %v6311_v13 }
  0x2d   : > { %5553 = vmatpush3.bf16.msra.mxu0 %v5550_v18  ;;  %v4155_v18 = vld [vmem:[%s7829_s3 + $0x28] sm:$0xff] }
  0x2e   : > { %5555 = vmatprep.subr.bf16.mxu0 %v5554_v21  ;;  %v5570_v19 = vpack.c.bf16 %v4155_v18, %v4154_v17 }
  0x2f   : > { %5645 = vmatpush3.bf16.msra.mxu1 %v6311_v13 }
  0x30   : > { %5595 = vmatprep.subr.bf16.mxu1 %v6321_v16 }
  0x31   : > { %5557 = vmatpush3.bf16.msra.mxu0 %v5554_v21  ;;  %v4157_v21 = vld [vmem:[%s7829_s3 + $0x38] sm:$0xff] }
  0x32   : > { %5559 = vmatprep.subr.bf16.mxu0 %v5558_v24  ;;  %v5574_v22 = vpack.c.bf16 %v4157_v21, %v4156_v20 }
  0x35   : > { %5561 = vmatpush3.bf16.msra.mxu0 %v5558_v24 }
  0x36   : > { %5563 = vmatprep.subr.bf16.mxu0 %v5562_v59 }
  0x38   : > { %4923 = vmatmul.mubr.f32.vlgmr.msra.gmra.mrb[0].mxu0 %v278_v25 }
  0x39   : > { %4925 = vmatprep.mubr.f32.mxu0 %v279_v26  ;;  %5565 = vmatpush3.bf16.msra.mxu0 %v5562_v59 }
  0x3a   : > { %5567 = vmatprep.subr.bf16.mxu0 %v5566_v63 }
  0x3c   : > { %4926 = vmatmul.mubr.f32.gmra.mrb[2].mxu0 %v280_v27 }
  0x3d   : > { %4928 = vmatprep.mubr.f32.mxu0 %v281_v28  ;;  %5569 = vmatpush3.bf16.msra.mxu0 %v5566_v63 }
  0x3e   : > { %5571 = vmatprep.subr.bf16.mxu0 %v5570_v19 }
  0x40   : > { %4929 = vmatmul.mubr.f32.gmra.mrb[4].mxu0 %v282_v29 }
  0x41   : > { %4931 = vmatprep.mubr.f32.mxu0 %v283_v30 }
  0x44   : > { %4932 = vmatmul.mubr.f32.gmra.mrb[6].mxu0 %v284_v31 }
  0x45   : > { %4934 = vmatprep.mubr.f32.mxu0 %v285_v32 }
  0x48   : > { %4935 = vmatmul.mubr.f32.gmra.mrb[8].mxu0 %v286_v33  ;;  %v4190_v33 = vld [vmem:[%s7829_s3 + $0x40] sm:$0xff] }
  0x49   : > { %4937 = vmatprep.mubr.f32.mxu0 %v287_v34  ;;  %v4191_v34 = vld [vmem:[%s7829_s3 + $0x48] sm:$0xff] }
  0x4c   : > { %4938 = vmatmul.mubr.f32.gmra.mrb[10].mxu0 %v288_v35 }
  0x4d   : > { %4940 = vmatprep.mubr.f32.mxu0 %v289_v36  ;;  %v6353_v36 = vpack.c.bf16 %v4191_v34, %v4190_v33 }
  0x50   : > { %4941 = vmatmul.mubr.f32.gmra.mrb[12].mxu0 %v290_v37 }
  0x51   : > { %4943 = vmatprep.mubr.f32.mxu0 %v291_v38 }
  0x54   : > { %4944 = vmatmul.mubr.f32.gmra.mrb[14].mxu0 %v292_v39 }
  0x55   : > { %4946 = vmatprep.mubr.f32.mxu0 %v293_v40 }
  0x58   : > { %4947 = vmatmul.mubr.f32.gmra.mrb[16].mxu0 %v294_v41 }
  0x59   : > { %4949 = vmatprep.mubr.f32.mxu0 %v295_v42 }
  0x5c   : > { %4950 = vmatmul.mubr.f32.gmra.mrb[18].mxu0 %v296_v43 }
  0x5d   : > { %4952 = vmatprep.mubr.f32.mxu0 %v297_v44 }
  0x60   : > { %4953 = vmatmul.mubr.f32.gmra.mrb[20].mxu0 %v298_v45 }
  0x61   : > { %4955 = vmatprep.mubr.f32.mxu0 %v299_v46 }
  0x64   : > { %4956 = vmatmul.mubr.f32.gmra.mrb[22].mxu0 %v300_v47 }
  0x65   : > { %4958 = vmatprep.mubr.f32.mxu0 %v301_v48 }
  0x68   : > { %4959 = vmatmul.mubr.f32.gmra.mrb[24].mxu0 %v302_v49 }
  0x69   : > { %4961 = vmatprep.mubr.f32.mxu0 %v303_v50 }
  0x6c   : > { %4962 = vmatmul.mubr.f32.gmra.mrb[26].mxu0 %v304_v51 }
  0x6d   : > { %4964 = vmatprep.mubr.f32.mxu0 %v305_v52 }
  0x70   : > { %4965 = vmatmul.mubr.f32.gmra.mrb[28].mxu0 %v306_v53 }
  0x71   : > { %4967 = vmatprep.mubr.f32.mxu0 %v307_v54 }
  0x74   : > { %4968 = vmatmul.mubr.f32.gmra.mrb[30].mxu0 %v308_v55 }
  0x75   : > { %4978 = vmatprep.mubr.msk.f32.mxu0 %vm589_vm0, %v853_v6 }
  0x78   : > { %4979 = vmatmul.mubr.msk.f32.vlgmr.msra.gmra.mrb[32].mxu0 %vm589_vm0, %v817_v7 }
  0x79   : > { %5573 = vmatpush3.bf16.msra.mxu0 %v5570_v19 }
  0x7a   : > { %5575 = vmatprep.subr.bf16.mxu0 %v5574_v22 }
  0x7d   : > { %5577 = vmatpush3.bf16.msra.mxu0 %v5574_v22 }
  0x7e   : > { %5579 = vmatprep.subr.bf16.mxu0 %v6353_v36 }
 0x10b   : > { %v4924_v24 = vpop.f32.mrb[0].mxu0 }
 0x10c   : > { %v404_v25 = vadd.f32 %v4924_v24, %v6339_v23  ;;  %v398_v26 = vpop.f32.mrb[1].mxu0 }
 0x10d   : > { %v399_v27 = vadd.f32 %v6339_v23, %v398_v26 }
 0x10e   : > { %v558_v28 = vmax.f32 %v404_v25, 0.0 }
 0x10f   : > { %v557_v29 = vmax.f32 %v399_v27, 0.0  ;;  %v4927_v30 = vpop.f32.mrb[2].mxu0 }
 0x110   : > { %597 = vst.msk [vmem:[#allocation2 + $0x18] sm:$0xff] %vm589_vm0, %v558_v28  ;;  %v414_v31 = vadd.f32 %v4927_v30, %v6339_v23  ;;  %v408_v32 = vpop.f32.mrb[3].mxu0 }
 0x111   : > { %596 = vst.msk [vmem:[#allocation2 + $0x10] sm:$0xff] %vm589_vm0, %v557_v29  ;;  %v409_v35 = vadd.f32 %v6339_v23, %v408_v32 }
 0x112   : > { %v560_v37 = vmax.f32 %v414_v31, 0.0 }
 0x113   : > { %v559_v38 = vmax.f32 %v409_v35, 0.0  ;;  %v4930_v39 = vpop.f32.mrb[4].mxu0 }
 0x114   : > { %599 = vst.msk [vmem:[#allocation2 + $0x28] sm:$0xff] %vm589_vm0, %v560_v37  ;;  %v424_v40 = vadd.f32 %v4930_v39, %v6339_v23  ;;  %v418_v41 = vpop.f32.mrb[5].mxu0 }
 0x115   : > { %598 = vst.msk [vmem:[#allocation2 + $0x20] sm:$0xff] %vm589_vm0, %v559_v38  ;;  %v419_v42 = vadd.f32 %v6339_v23, %v418_v41 }
 0x116   : > { %v562_v43 = vmax.f32 %v424_v40, 0.0 }
 0x117   : > { %v561_v44 = vmax.f32 %v419_v42, 0.0  ;;  %v4933_v45 = vpop.f32.mrb[6].mxu0  ;;  %v6360_v46 = vld [vmem:[#allocation2 + $0x18] sm:$0xff] }
 0x118   : > { %601 = vst.msk [vmem:[#allocation2 + $0x38] sm:$0xff] %vm589_vm0, %v562_v43  ;;  %v434_v47 = vadd.f32 %v4933_v45, %v6339_v23  ;;  %v428_v48 = vpop.f32.mrb[7].mxu0  ;;  %v6364_v49 = vld [vmem:[#allocation2 + $0x10] sm:$0xff]  ;;  %v799_v50 = vrot.slane %v6360_v46, 7 }
 0x119   : > { %600 = vst.msk [vmem:[#allocation2 + $0x30] sm:$0xff] %vm589_vm0, %v561_v44  ;;  %v429_v51 = vadd.f32 %v6339_v23, %v428_v48  ;;  %v781_v52 = vrot.slane %v6364_v49, 7 }
 0x11a   : > { %v564_v53 = vmax.f32 %v434_v47, 0.0 }
 0x11b   : > { %v563_v54 = vmax.f32 %v429_v51, 0.0  ;;  %v4936_v55 = vpop.f32.mrb[8].mxu0  ;;  %v836_v56 = vsel %vm816_vm1, %v799_v50, %v781_v52  ;;  %v6372_v57 = vld [vmem:[#allocation2 + $0x28] sm:$0xff]  ;;  %v6389_v3 = vsel %vm816_vm1, %v781_v52, %v799_v50 }
 0x11c   : > { %603 = vst.msk [vmem:[#allocation2 + $0x48] sm:$0xff] %vm589_vm0, %v564_v53  ;;  %v444_v58 = vadd.f32 %v4936_v55, %v6339_v23  ;;  %v438_v59 = vpop.f32.mrb[9].mxu0  ;;  %v6378_v60 = vsel %vm778_vm2, 0.0, %v836_v56  ;;  %v6380_v61 = vld [vmem:[#allocation2 + $0x20] sm:$0xff]  ;;  %v800_v62 = vrot.slane %v6372_v57, 7 }
 0x11d   : > { %602 = vst.msk [vmem:[#allocation2 + $0x40] sm:$0xff] %vm589_vm0, %v563_v54  ;;  %v439_v63 = vadd.f32 %v6339_v23, %v438_v59  ;;  %4981 = vmatprep.mubr.msk.f32.mxu0 %vm589_vm0, %v6378_v60  ;;  %v782_v4 = vrot.slane %v6380_v61, 7 }
 0x11e   : > { %v566_v5 = vmax.f32 %v444_v58, 0.0  ;;  %4982 = vmatmul.mubr.msk.f32.gmra.mrb[34].mxu0 %vm589_vm0, %v6389_v3 }
 0x11f   : > { %v565_v6 = vmax.f32 %v439_v63, 0.0  ;;  %v4939_v7 = vpop.f32.mrb[10].mxu0  ;;  %v837_v8 = vsel %vm816_vm1, %v800_v62, %v782_v4  ;;  %v6396_v9 = vld [vmem:[#allocation2 + $0x38] sm:$0xff]  ;;  %v6413_v19 = vsel %vm816_vm1, %v782_v4, %v800_v62 }
 0x120   : > { %605 = vst.msk [vmem:[#allocation2 + $0x58] sm:$0xff] %vm589_vm0, %v566_v5  ;;  %v454_v11 = vadd.f32 %v4939_v7, %v6339_v23  ;;  %v448_v12 = vpop.f32.mrb[11].mxu0  ;;  %v6402_v14 = vsel %vm778_vm2, 0.0, %v837_v8  ;;  %v6404_v15 = vld [vmem:[#allocation2 + $0x30] sm:$0xff]  ;;  %v801_v17 = vrot.slane %v6396_v9, 7  ;;  %v4265_v8 = vld [vmem:[%s7829_s3 + $0x98] sm:$0xff] }
 0x121   : > { %604 = vst.msk [vmem:[#allocation2 + $0x50] sm:$0xff] %vm589_vm0, %v565_v6  ;;  %v449_v18 = vadd.f32 %v6339_v23, %v448_v12  ;;  %4984 = vmatprep.mubr.msk.f32.mxu0 %vm589_vm0, %v6402_v14  ;;  %v783_v20 = vrot.slane %v6404_v15, 7  ;;  %v4264_v7 = vld [vmem:[%s7829_s3 + $0x90] sm:$0xff] }
 0x122   : > { %v568_v21 = vmax.f32 %v454_v11, 0.0  ;;  %4985 = vmatmul.mubr.msk.f32.gmra.mrb[36].mxu0 %vm589_vm0, %v6413_v19 }
 0x123   : > { %v567_v22 = vmax.f32 %v449_v18, 0.0  ;;  %v4942_v24 = vpop.f32.mrb[12].mxu0  ;;  %v838_v25 = vsel %vm816_vm1, %v801_v17, %v783_v20  ;;  %v6420_v26 = vld [vmem:[#allocation2 + $0x48] sm:$0xff]  ;;  %v6437_v33 = vsel %vm816_vm1, %v783_v20, %v801_v17 }
 0x124   : > { %607 = vst.msk [vmem:[#allocation2 + $0x68] sm:$0xff] %vm589_vm0, %v568_v21  ;;  %v464_v27 = vadd.f32 %v4942_v24, %v6339_v23  ;;  %v458_v28 = vpop.f32.mrb[13].mxu0  ;;  %v6426_v29 = vsel %vm778_vm2, 0.0, %v838_v25  ;;  %v6428_v30 = vld [vmem:[#allocation2 + $0x40] sm:$0xff]  ;;  %v802_v31 = vrot.slane %v6420_v26, 7 }
 0x125   : > { %606 = vst.msk [vmem:[#allocation2 + $0x60] sm:$0xff] %vm589_vm0, %v567_v22  ;;  %v459_v32 = vadd.f32 %v6339_v23, %v458_v28  ;;  %4987 = vmatprep.mubr.msk.f32.mxu0 %vm589_vm0, %v6426_v29  ;;  %v784_v34 = vrot.slane %v6428_v30, 7  ;;  %v5598_v28 = vpack.c.bf16 %v4265_v8, %v4264_v7 }
 0x126   : > { %v570_v35 = vmax.f32 %v464_v27, 0.0  ;;  %4988 = vmatmul.mubr.msk.f32.gmra.mrb[38].mxu0 %vm589_vm0, %v6437_v33 }
 0x127   : > { %v569_v37 = vmax.f32 %v459_v32, 0.0  ;;  %v4945_v38 = vpop.f32.mrb[14].mxu0  ;;  %v839_v39 = vsel %vm816_vm1, %v802_v31, %v784_v34  ;;  %v6444_v40 = vld [vmem:[#allocation2 + $0x58] sm:$0xff]  ;;  %v6461_v48 = vsel %vm816_vm1, %v784_v34, %v802_v31 }
 0x128   : > { %609 = vst.msk [vmem:[#allocation2 + $0x78] sm:$0xff] %vm589_vm0, %v570_v35  ;;  %v474_v41 = vadd.f32 %v4945_v38, %v6339_v23  ;;  %v468_v42 = vpop.f32.mrb[15].mxu0  ;;  %v6450_v43 = vsel %vm778_vm2, 0.0, %v839_v39  ;;  %v6452_v44 = vld [vmem:[#allocation2 + $0x50] sm:$0xff]  ;;  %v803_v45 = vrot.slane %v6444_v40, 7  ;;  %v4298_v35 = vld [vmem:[%s7829_s3 + $0xa0] sm:$0xff] }
 0x129   : > { %608 = vst.msk [vmem:[#allocation2 + $0x70] sm:$0xff] %vm589_vm0, %v569_v37  ;;  %v469_v47 = vadd.f32 %v6339_v23, %v468_v42  ;;  %4990 = vmatprep.mubr.msk.f32.mxu0 %vm589_vm0, %v6450_v43  ;;  %v785_v50 = vrot.slane %v6452_v44, 7  ;;  %v4299_v37 = vld [vmem:[%s7829_s3 + $0xa8] sm:$0xff] }
 0x12a   : > { %v572_v51 = vmax.f32 %v474_v41, 0.0  ;;  %4991 = vmatmul.mubr.msk.f32.gmra.mrb[40].mxu0 %vm589_vm0, %v6461_v48 }
 0x12b   : > { %v571_v52 = vmax.f32 %v469_v47, 0.0  ;;  %v4948_v53 = vpop.f32.mrb[16].mxu0  ;;  %v840_v54 = vsel %vm816_vm1, %v803_v45, %v785_v50  ;;  %v6468_v55 = vld [vmem:[#allocation2 + $0x68] sm:$0xff]  ;;  %v6485_v5 = vsel %vm816_vm1, %v785_v50, %v803_v45 }
 0x12c   : > { %611 = vst.msk [vmem:[#allocation2 + $0x88] sm:$0xff] %vm589_vm0, %v572_v51  ;;  %v484_v56 = vadd.f32 %v4948_v53, %v6339_v23  ;;  %v478_v58 = vpop.f32.mrb[17].mxu0  ;;  %v6474_v59 = vsel %vm778_vm2, 0.0, %v840_v54  ;;  %v6476_v62 = vld [vmem:[#allocation2 + $0x60] sm:$0xff]  ;;  %v804_v63 = vrot.slane %v6468_v55, 7 }
 0x12d   : > { %610 = vst.msk [vmem:[#allocation2 + $0x80] sm:$0xff] %vm589_vm0, %v571_v52  ;;  %v479_v4 = vadd.f32 %v6339_v23, %v478_v58  ;;  %4993 = vmatprep.mubr.msk.f32.mxu0 %vm589_vm0, %v6474_v59  ;;  %v786_v6 = vrot.slane %v6476_v62, 7 }
 0x12e   : > { %v574_v11 = vmax.f32 %v484_v56, 0.0  ;;  %4994 = vmatmul.mubr.msk.f32.gmra.mrb[42].mxu0 %vm589_vm0, %v6485_v5 }
 0x12f   : > { %v573_v12 = vmax.f32 %v479_v4, 0.0  ;;  %v4951_v17 = vpop.f32.mrb[18].mxu0  ;;  %v841_v18 = vsel %vm816_vm1, %v804_v63, %v786_v6  ;;  %v6498_v20 = vld [vmem:[#allocation2 + $0x78] sm:$0xff]  ;;  %v6517_v32 = vsel %vm816_vm1, %v786_v6, %v804_v63 }
 0x130   : > { %613 = vst.msk [vmem:[#allocation2 + $0x98] sm:$0xff] %vm589_vm0, %v574_v11  ;;  %v494_v21 = vadd.f32 %v4951_v17, %v6339_v23  ;;  %v488_v22 = vpop.f32.mrb[19].mxu0  ;;  %v6504_v24 = vsel %vm778_vm2, 0.0, %v841_v18  ;;  %v6506_v25 = vld [vmem:[#allocation2 + $0x70] sm:$0xff]  ;;  %v805_v27 = vrot.slane %v6498_v20, 7 }
 0x131   : > { %612 = vst.msk [vmem:[#allocation2 + $0x90] sm:$0xff] %vm589_vm0, %v573_v12  ;;  %v489_v31 = vadd.f32 %v6339_v23, %v488_v22  ;;  %4996 = vmatprep.mubr.msk.f32.mxu0 %vm589_vm0, %v6504_v24  ;;  %5161 = vmatprep.mubr.msk.f32.mxu1 %vm589_vm0, %v6504_v24  ;;  %v787_v34 = vrot.slane %v6506_v25, 7 }
 0x132   : > { %v576_v38 = vmax.f32 %v494_v21, 0.0  ;;  %4997 = vmatmul.mubr.msk.f32.gmra.mrb[44].mxu0 %vm589_vm0, %v6517_v32  ;;  %5162 = vmatmul.mubr.msk.f32.vlgmr.msra.gmra.mrb[0].mxu1 %vm589_vm0, %v6517_v32 }
 0x133   : > { %v575_v39 = vmax.f32 %v489_v31, 0.0  ;;  %5597 = vmatpush3.bf16.msra.mxu1 %v6321_v16  ;;  %v4954_v41 = vpop.f32.mrb[20].mxu0  ;;  %v842_v42 = vsel %vm816_vm1, %v805_v27, %v787_v34  ;;  %v6533_v45 = vld [vmem:[#allocation2 + $0x88] sm:$0xff]  ;;  %v6544_v16 = vpack.c.bf16 %v4299_v37, %v4298_v35  ;;  %v6554_v56 = vsel %vm816_vm1, %v787_v34, %v805_v27 }
 0x134   : > { %615 = vst.msk [vmem:[#allocation2 + $0xa8] sm:$0xff] %vm589_vm0, %v576_v38  ;;  %v504_v47 = vadd.f32 %v4954_v41, %v6339_v23  ;;  %v498_v50 = vpop.f32.mrb[21].mxu0  ;;  %v6539_v51 = vsel %vm778_vm2, 0.0, %v842_v42  ;;  %v6541_v52 = vld [vmem:[#allocation2 + $0x80] sm:$0xff]  ;;  %v806_v53 = vrot.slane %v6533_v45, 7  ;;  %5599 = vmatprep.subr.bf16.mxu1 %v5598_v28 }
 0x135   : > { %614 = vst.msk [vmem:[#allocation2 + $0xa0] sm:$0xff] %vm589_vm0, %v575_v39  ;;  %v499_v54 = vadd.f32 %v6339_v23, %v498_v50  ;;  %4999 = vmatprep.mubr.msk.f32.mxu0 %vm589_vm0, %v6539_v51  ;;  %5164 = vmatprep.mubr.msk.f32.mxu1 %vm589_vm0, %v6539_v51  ;;  %v788_v58 = vrot.slane %v6541_v52, 7 }
 0x136   : > { %v578_v63 = vmax.f32 %v504_v47, 0.0  ;;  %5000 = vmatmul.mubr.msk.f32.gmra.mrb[46].mxu0 %vm589_vm0, %v6554_v56  ;;  %5165 = vmatmul.mubr.msk.f32.gmra.mrb[2].mxu1 %vm589_vm0, %v6554_v56 }
 0x137   : > { %v577_v4 = vmax.f32 %v499_v54, 0.0  ;;  %v4957_v6 = vpop.f32.mrb[22].mxu0  ;;  %v843_v7 = vsel %vm816_vm1, %v806_v53, %v788_v58  ;;  %v6563_v8 = vld [vmem:[#allocation2 + $0x98] sm:$0xff]  ;;  %5601 = vmatpush3.bf16.msra.mxu1 %v5598_v28  ;;  %v6583_v27 = vsel %vm816_vm1, %v788_v58, %v806_v53 }
 0x138   : > { %617 = vst.msk [vmem:[#allocation2 + $0xb8] sm:$0xff] %vm589_vm0, %v578_v63  ;;  %v514_v11 = vadd.f32 %v4957_v6, %v6339_v23  ;;  %v508_v12 = vpop.f32.mrb[23].mxu0  ;;  %v6569_v17 = vsel %vm778_vm2, 0.0, %v843_v7  ;;  %v6571_v18 = vld [vmem:[#allocation2 + $0x90] sm:$0xff]  ;;  %v807_v21 = vrot.slane %v6563_v8, 7  ;;  %5603 = vmatprep.subr.bf16.mxu1 %v6544_v16  ;;  %7862 = vst [vmem:[#allocation6_spill] sm:$0xff] %v6583_v27 }
 0x139   : > { %616 = vst.msk [vmem:[#allocation2 + $0xb0] sm:$0xff] %vm589_vm0, %v577_v4  ;;  %v509_v22 = vadd.f32 %v6339_v23, %v508_v12  ;;  %5002 = vmatprep.mubr.msk.f32.mxu0 %vm589_vm0, %v6569_v17  ;;  %5167 = vmatprep.mubr.msk.f32.mxu1 %vm589_vm0, %v6569_v17  ;;  %v789_v28 = vrot.slane %v6571_v18, 7 }
 0x13a   : > { %v580_v31 = vmax.f32 %v514_v11, 0.0  ;;  %5003 = vmatmul.mubr.msk.f32.gmra.mrb[48].mxu0 %vm589_vm0, %v6583_v27  ;;  %5168 = vmatmul.mubr.msk.f32.gmra.mrb[4].mxu1 %vm589_vm0, %v6583_v27 }
 0x13b   : > { %v579_v34 = vmax.f32 %v509_v22, 0.0  ;;  %v4960_v35 = vpop.f32.mrb[24].mxu0  ;;  %v844_v37 = vsel %vm816_vm1, %v807_v21, %v789_v28  ;;  %v6592_v38 = vld [vmem:[#allocation2 + $0xa8] sm:$0xff]  ;;  %v6611_v54 = vsel %vm816_vm1, %v789_v28, %v807_v21 }
 0x13c   : > { %619 = vst.msk [vmem:[#allocation2 + $0xc8] sm:$0xff] %vm589_vm0, %v580_v31  ;;  %v524_v39 = vadd.f32 %v4960_v35, %v6339_v23  ;;  %v518_v41 = vpop.f32.mrb[25].mxu0  ;;  %v6598_v42 = vsel %vm778_vm2, 0.0, %v844_v37  ;;  %v6600_v47 = vld [vmem:[#allocation2 + $0xa0] sm:$0xff]  ;;  %v808_v50 = vrot.slane %v6592_v38, 7  ;;  %7864 = vst [vmem:[#allocation8_spill] sm:$0xff] %v6611_v54 }
 0x13d   : > { %7863 = vst [vmem:[#allocation7_spill] sm:$0xff] %v6598_v42  ;;  %618 = vst.msk [vmem:[#allocation2 + $0xc0] sm:$0xff] %vm589_vm0, %v579_v34  ;;  %v519_v53 = vadd.f32 %v6339_v23, %v518_v41  ;;  %5005 = vmatprep.mubr.msk.f32.mxu0 %vm589_vm0, %v6598_v42  ;;  %5170 = vmatprep.mubr.msk.f32.mxu1 %vm589_vm0, %v6598_v42  ;;  %v790_v58 = vrot.slane %v6600_v47, 7  ;;  %v4301_v42 = vld [vmem:[%s7829_s3 + $0xb8] sm:$0xff] }
 0x13e   : > { %v582_v63 = vmax.f32 %v524_v39, 0.0  ;;  %5006 = vmatmul.mubr.msk.f32.gmra.mrb[50].mxu0 %vm589_vm0, %v6611_v54  ;;  %5171 = vmatmul.mubr.msk.f32.gmra.mrb[6].mxu1 %vm589_vm0, %v6611_v54  ;;  %v4300_v54 = vld [vmem:[%s7829_s3 + $0xb0] sm:$0xff] }
 0x13f   : > { %v581_v4 = vmax.f32 %v519_v53, 0.0  ;;  %v4963_v6 = vpop.f32.mrb[26].mxu0  ;;  %v845_v7 = vsel %vm816_vm1, %v808_v50, %v790_v58  ;;  %v6620_v11 = vld [vmem:[#allocation2 + $0xb8] sm:$0xff]  ;;  %v6639_v35 = vsel %vm816_vm1, %v790_v58, %v808_v50 }
 0x140   : > { %621 = vst.msk [vmem:[#allocation2 + $0xd8] sm:$0xff] %vm589_vm0, %v582_v63  ;;  %v534_v12 = vadd.f32 %v4963_v6, %v6339_v23  ;;  %v528_v21 = vpop.f32.mrb[27].mxu0  ;;  %v6626_v22 = vsel %vm778_vm2, 0.0, %v845_v7  ;;  %v6628_v28 = vld [vmem:[#allocation2 + $0xb0] sm:$0xff]  ;;  %v809_v31 = vrot.slane %v6620_v11, 7  ;;  %7866 = vst [vmem:[#allocation10_spill] sm:$0xff] %v6639_v35 }
 0x141   : > { %7865 = vst [vmem:[#allocation9_spill] sm:$0xff] %v6626_v22  ;;  %620 = vst.msk [vmem:[#allocation2 + $0xd0] sm:$0xff] %vm589_vm0, %v581_v4  ;;  %v529_v34 = vadd.f32 %v6339_v23, %v528_v21  ;;  %5008 = vmatprep.mubr.msk.f32.mxu0 %vm589_vm0, %v6626_v22  ;;  %5173 = vmatprep.mubr.msk.f32.mxu1 %vm589_vm0, %v6626_v22  ;;  %v791_v37 = vrot.slane %v6628_v28, 7 }
 0x142   : > { %v584_v39 = vmax.f32 %v534_v12, 0.0  ;;  %5009 = vmatmul.mubr.msk.f32.gmra.mrb[52].mxu0 %vm589_vm0, %v6639_v35  ;;  %5174 = vmatmul.mubr.msk.f32.gmra.mrb[8].mxu1 %vm589_vm0, %v6639_v35 }
 0x143   : > { %v583_v41 = vmax.f32 %v529_v34, 0.0  ;;  %v4966_v53 = vpop.f32.mrb[28].mxu0  ;;  %v846_v63 = vsel %vm816_vm1, %v809_v31, %v791_v37  ;;  %v6648_v4 = vld [vmem:[#allocation2 + $0xc8] sm:$0xff]  ;;  %v6667_v34 = vsel %vm816_vm1, %v791_v37, %v809_v31 }
 0x144   : > { %623 = vst.msk [vmem:[#allocation2 + $0xe8] sm:$0xff] %vm589_vm0, %v584_v39  ;;  %v544_v50 = vadd.f32 %v4966_v53, %v6339_v23  ;;  %v538_v58 = vpop.f32.mrb[29].mxu0  ;;  %v6654_v6 = vsel %vm778_vm2, 0.0, %v846_v63  ;;  %v6656_v7 = vld [vmem:[#allocation2 + $0xc0] sm:$0xff]  ;;  %v810_v12 = vrot.slane %v6648_v4, 7  ;;  %7868 = vst [vmem:[#allocation12_spill] sm:$0xff] %v6667_v34 }
 0x145   : > { %7867 = vst [vmem:[#allocation11_spill] sm:$0xff] %v6654_v6  ;;  %622 = vst.msk [vmem:[#allocation2 + $0xe0] sm:$0xff] %vm589_vm0, %v583_v41  ;;  %v539_v21 = vadd.f32 %v6339_v23, %v538_v58  ;;  %5011 = vmatprep.mubr.msk.f32.mxu0 %vm589_vm0, %v6654_v6  ;;  %5176 = vmatprep.mubr.msk.f32.mxu1 %vm589_vm0, %v6654_v6  ;;  %v792_v39 = vrot.slane %v6656_v7, 7 }
 0x146   : > { %v586_v53 = vmax.f32 %v544_v50, 0.0  ;;  %5012 = vmatmul.mubr.msk.f32.gmra.mrb[54].mxu0 %vm589_vm0, %v6667_v34  ;;  %5177 = vmatmul.mubr.msk.f32.gmra.mrb[10].mxu1 %vm589_vm0, %v6667_v34 }
 0x147   : > { %v585_v41 = vmax.f32 %v539_v21, 0.0  ;;  %v4969_v63 = vpop.f32.mrb[30].mxu0  ;;  %v847_v58 = vsel %vm816_vm1, %v810_v12, %v792_v39  ;;  %v6676_v35 = vld [vmem:[#allocation2 + $0xd8] sm:$0xff] }
 0x148   : > { %625 = vst.msk [vmem:[#allocation2 + $0xf8] sm:$0xff] %vm589_vm0, %v586_v53  ;;  %v554_v31 = vadd.f32 %v4969_v63, %v6339_v23  ;;  %v548_v37 = vpop.f32.mrb[31].mxu0  ;;  %v6682_v50 = vsel %vm778_vm2, 0.0, %v847_v58  ;;  %v6684_v6 = vld [vmem:[#allocation2 + $0xd0] sm:$0xff]  ;;  %v811_v34 = vrot.slane %v6676_v35, 7  ;;  %v6695_v53 = vsel %vm816_vm1, %v792_v39, %v810_v12 }
 0x149   : > { %7869 = vst [vmem:[#allocation13_spill] sm:$0xff] %v6682_v50  ;;  %624 = vst.msk [vmem:[#allocation2 + $0xf0] sm:$0xff] %vm589_vm0, %v585_v41  ;;  %v549_v21 = vadd.f32 %v6339_v23, %v548_v37  ;;  %5014 = vmatprep.mubr.msk.f32.mxu0 %vm589_vm0, %v6682_v50  ;;  %5179 = vmatprep.mubr.msk.f32.mxu1 %vm589_vm0, %v6682_v50  ;;  %v793_v63 = vrot.slane %v6684_v6, 7 }
 0x14a   : > { %7870 = vst [vmem:[#allocation14_spill] sm:$0xff] %v6695_v53  ;;  %v588_v58 = vmax.f32 %v554_v31, 0.0  ;;  %5015 = vmatmul.mubr.msk.f32.gmra.mrb[56].mxu0 %vm589_vm0, %v6695_v53  ;;  %5180 = vmatmul.mubr.msk.f32.gmra.mrb[12].mxu1 %vm589_vm0, %v6695_v53 }
 0x14b   : > { %v587_v23 = vmax.f32 %v549_v21, 0.0  ;;  %v848_v41 = vsel %vm816_vm1, %v811_v34, %v793_v63  ;;  %v6704_v37 = vld [vmem:[#allocation2 + $0xe8] sm:$0xff]  ;;  %v6721_v21 = vsel %vm816_vm1, %v793_v63, %v811_v34 }
 0x14c   : > { %627 = vst.msk [vmem:[#allocation2 + $0x108] sm:$0xff] %vm589_vm0, %v588_v58  ;;  %v6709_v12 = vsel %vm778_vm2, 0.0, %v848_v41  ;;  %v6711_v39 = vld [vmem:[#allocation2 + $0xe0] sm:$0xff]  ;;  %v812_v31 = vrot.slane %v6704_v37, 7  ;;  %7872 = vst [vmem:[#allocation16_spill] sm:$0xff] %v6721_v21 }
 0x14d   : > { %7871 = vst [vmem:[#allocation15_spill] sm:$0xff] %v6709_v12  ;;  %626 = vst.msk [vmem:[#allocation2 + $0x100] sm:$0xff] %vm589_vm0, %v587_v23  ;;  %5017 = vmatprep.mubr.msk.f32.mxu0 %vm589_vm0, %v6709_v12  ;;  %5182 = vmatprep.mubr.msk.f32.mxu1 %vm589_vm0, %v6709_v12  ;;  %v794_v58 = vrot.slane %v6711_v39, 7 }
 0x14e   : > { %5018 = vmatmul.mubr.msk.f32.gmra.mrb[58].mxu0 %vm589_vm0, %v6721_v21  ;;  %5183 = vmatmul.mubr.msk.f32.gmra.mrb[14].mxu1 %vm589_vm0, %v6721_v21 }
 0x14f   : > { %v849_v23 = vsel %vm816_vm1, %v812_v31, %v794_v58  ;;  %v6730_v41 = vld [vmem:[#allocation2 + $0xf8] sm:$0xff]  ;;  %v6745_v63 = vsel %vm816_vm1, %v794_v58, %v812_v31 }
 0x150   : > { %v6734_v12 = vsel %vm778_vm2, 0.0, %v849_v23  ;;  %v6736_v53 = vld [vmem:[#allocation2 + $0xf0] sm:$0xff]  ;;  %v813_v34 = vrot.slane %v6730_v41, 7  ;;  %7874 = vst [vmem:[#allocation18_spill] sm:$0xff] %v6745_v63 }
 0x151   : > { %7873 = vst [vmem:[#allocation17_spill] sm:$0xff] %v6734_v12  ;;  %5020 = vmatprep.mubr.msk.f32.mxu0 %vm589_vm0, %v6734_v12  ;;  %5185 = vmatprep.mubr.msk.f32.mxu1 %vm589_vm0, %v6734_v12  ;;  %v795_v21 = vrot.slane %v6736_v53, 7 }
 0x152   : > { %5021 = vmatmul.mubr.msk.f32.gmra.mrb[60].mxu0 %vm589_vm0, %v6745_v63  ;;  %5186 = vmatmul.mubr.msk.f32.gmra.mrb[16].mxu1 %vm589_vm0, %v6745_v63 }
 0x153   : > { %v850_v23 = vsel %vm816_vm1, %v813_v34, %v795_v21  ;;  %v6754_v50 = vld [vmem:[#allocation2 + $0x108] sm:$0xff]  ;;  %v6769_v58 = vsel %vm816_vm1, %v795_v21, %v813_v34 }
 0x154   : > { %v6758_v12 = vsel %vm778_vm2, 0.0, %v850_v23  ;;  %v6760_v22 = vld [vmem:[#allocation2 + $0x100] sm:$0xff]  ;;  %v814_v31 = vrot.slane %v6754_v50, 7  ;;  %7876 = vst [vmem:[#allocation20_spill] sm:$0xff] %v6769_v58  ;;  %v4192_v23 = vld [vmem:[%s7829_s3 + $0x50] sm:$0xff] }
 0x155   : > { %7875 = vst [vmem:[#allocation19_spill] sm:$0xff] %v6758_v12  ;;  %5023 = vmatprep.mubr.msk.f32.mxu0 %vm589_vm0, %v6758_v12  ;;  %5188 = vmatprep.mubr.msk.f32.mxu1 %vm589_vm0, %v6758_v12  ;;  %v796_v63 = vrot.slane %v6760_v22, 7  ;;  %v4193_v12 = vld [vmem:[%s7829_s3 + $0x58] sm:$0xff] }
 0x156   : > { %5024 = vmatmul.mubr.msk.f32.gmra.mrb[62].mxu0 %vm589_vm0, %v6769_v58  ;;  %5189 = vmatmul.mubr.msk.f32.gmra.mrb[18].mxu1 %vm589_vm0, %v6769_v58  ;;  %v5582_v27 = vpack.c.bf16 %v4193_v12, %v4192_v23  ;;  %v4334_v12 = vld [vmem:[%s7829_s3 + $0xc0] sm:$0xff]  ;;  %v688_v23 = vrot.slane %v6360_v46, 1 }
 0x157   : > { %5034 = vmatprep.mubr.msk.f32.mxu0 %vm589_vm0, %v6277_v0  ;;  %v851_v21 = vsel %vm816_vm1, %v814_v31, %v796_v63  ;;  %v6794_v58 = vsel %vm816_vm1, %v796_v63, %v814_v31  ;;  %v5606_v63 = vpack.c.bf16 %v4301_v42, %v4300_v54  ;;  %v4335_v31 = vld [vmem:[%s7829_s3 + $0xc8] sm:$0xff]  ;;  %v6933_v42 = vadd.s32 8, %v6281_v2 }
 0x158   : > { %v6788_v34 = vsel %vm778_vm2, 0.0, %v851_v21  ;;  %v670_v54 = vrot.slane %v6364_v49, 1 }
 0x159   : > { %5191 = vmatprep.mubr.msk.f32.mxu1 %vm589_vm0, %v6788_v34  ;;  %vm668_vm4 = vcmp.eq.s32.totalorder %v6933_v42, 15 }
 0x15a   : > { %5035 = vmatmul.mubr.msk.f32.vlgmr.msra.gmra.mrb[32].mxu0 %vm589_vm0, %v6279_v1  ;;  %5192 = vmatmul.mubr.msk.f32.gmra.mrb[20].mxu1 %vm589_vm0, %v6794_v58 }
 0x15b   : > { %5037 = vmatprep.mubr.msk.f32.mxu0 %vm589_vm0, %v6364_v49  ;;  %5202 = vmatprep.mubr.msk.f32.mxu1 %vm589_vm0, %v6364_v49  ;;  %v725_v49 = vsel %vm705_vm3, %v688_v23, %v670_v54 }
 0x15c   : > { %5581 = vmatpush3.bf16.msra.mxu0 %v6353_v36  ;;  %v6826_v36 = vpack.c.bf16 %v4335_v31, %v4334_v12  ;;  %v4337_v12 = vld [vmem:[%s7829_s3 + $0xd8] sm:$0xff]  ;;  %v671_v31 = vrot.slane %v6380_v61, 1 }
 0x15d   : > { %5583 = vmatprep.subr.bf16.mxu0 %v5582_v27 }
 0x15e   : > { %5038 = vmatmul.mubr.msk.f32.gmra.mrb[34].mxu0 %vm589_vm0, %v6360_v46  ;;  %5203 = vmatmul.mubr.msk.f32.vlgmr.msra.gmra.mrb[22].mxu1 %vm589_vm0, %v6360_v46  ;;  %v707_v46 = vsel %vm705_vm3, %v670_v54, %v688_v23  ;;  %v4370_v54 = vld [vmem:[%s7829_s3 + $0xe0] sm:$0xff]  ;;  %v4371_v23 = vld [vmem:[%s7829_s3 + $0xe8] sm:$0xff] }
 0x15f   : > { %5605 = vmatpush3.bf16.msra.mxu1 %v6544_v16  ;;  %5040 = vmatprep.mubr.msk.f32.mxu0 %vm589_vm0, %v6380_v61  ;;  %v669_v16 = vrot.slane %v6277_v0, 1 }
 0x160   : > { %5205 = vmatprep.mubr.msk.f32.mxu1 %vm589_vm0, %v6380_v61  ;;  %5607 = vmatprep.subr.bf16.mxu1 %v5606_v63 }
 0x161   : > { %5585 = vmatpush3.bf16.msra.mxu0 %v5582_v27  ;;  %v687_v27 = vrot.slane %v6279_v1, 1 }
 0x162   : > { %5041 = vmatmul.mubr.msk.f32.gmra.mrb[36].mxu0 %vm589_vm0, %v6372_v57  ;;  %5206 = vmatmul.mubr.msk.f32.gmra.mrb[24].mxu1 %vm589_vm0, %v6372_v57 }
 0x163   : > { %5043 = vmatprep.mubr.msk.f32.mxu0 %vm589_vm0, %v6404_v15  ;;  %5208 = vmatprep.mubr.msk.f32.mxu1 %vm589_vm0, %v6404_v15  ;;  %v706_v0 = vsel %vm705_vm3, %v669_v16, %v687_v27  ;;  %v724_v1 = vsel %vm705_vm3, %v687_v27, %v669_v16  ;;  %v689_v16 = vrot.slane %v6372_v57, 1 }
 0x164   : > { %5609 = vmatpush3.bf16.msra.mxu1 %v5606_v63  ;;  %5587 = vmatprep.subr.bf16.mxu0 %v6301_v10  ;;  %v743_v21 = vsel %vm668_vm4, 0.0, %v724_v1  ;;  %v4336_v63 = vld [vmem:[%s7829_s3 + $0xd0] sm:$0xff]  ;;  %v672_v1 = vrot.slane %v6404_v15, 1  ;;  %v7003_v15 = vpack.c.bf16 %v4371_v23, %v4370_v54 }
 0x165   : > { %5611 = vmatprep.subr.bf16.mxu1 %v6826_v36  ;;  %v5614_v27 = vpack.c.bf16 %v4337_v12, %v4336_v63  ;;  %v6981_v61 = vsel %vm705_vm3, %v671_v31, %v689_v16  ;;  %v726_v57 = vsel %vm705_vm3, %v689_v16, %v671_v31  ;;  %v673_v63 = vrot.slane %v6428_v30, 1 }
 0x166   : > { %5044 = vmatmul.mubr.msk.f32.gmra.mrb[38].mxu0 %vm589_vm0, %v6396_v9  ;;  %5209 = vmatmul.mubr.msk.f32.gmra.mrb[26].mxu1 %vm589_vm0, %v6396_v9  ;;  %v691_v12 = vrot.slane %v6420_v26, 1  ;;  %v675_v16 = vrot.slane %v6476_v62, 1 }
 0x167   : > { %5046 = vmatprep.mubr.msk.f32.mxu0 %vm589_vm0, %v6428_v30  ;;  %5211 = vmatprep.mubr.msk.f32.mxu1 %vm589_vm0, %v6428_v30 }
 0x168   : > { %v728_v30 = vsel %vm705_vm3, %v691_v12, %v673_v63 }
 0x169   : > { %v7044_v31 = vsel %vm668_vm4, 0.0, %v728_v30 }
 0x16a   : > { %5047 = vmatmul.mubr.msk.f32.gmra.mrb[40].mxu0 %vm589_vm0, %v6420_v26  ;;  %5212 = vmatmul.mubr.msk.f32.gmra.mrb[28].mxu1 %vm589_vm0, %v6420_v26  ;;  %v7032_v26 = vsel %vm705_vm3, %v673_v63, %v691_v12  ;;  %v695_v63 = vrot.slane %v6533_v45, 1 }
 0x16b   : > { %5049 = vmatprep.mubr.msk.f32.mxu0 %vm589_vm0, %v6452_v44  ;;  %5214 = vmatprep.mubr.msk.f32.mxu1 %vm589_vm0, %v6452_v44 }
 0x16e   : > { %5050 = vmatmul.mubr.msk.f32.gmra.mrb[42].mxu0 %vm589_vm0, %v6444_v40  ;;  %5215 = vmatmul.mubr.msk.f32.gmra.mrb[30].mxu1 %vm589_vm0, %v6444_v40 }
 0x16f   : > { %5052 = vmatprep.mubr.msk.f32.mxu0 %vm589_vm0, %v6476_v62  ;;  %5217 = vmatprep.mubr.msk.f32.mxu1 %vm589_vm0, %v6476_v62 }
 0x172   : > { %5053 = vmatmul.mubr.msk.f32.gmra.mrb[44].mxu0 %vm589_vm0, %v6468_v55  ;;  %5218 = vmatmul.mubr.msk.f32.gmra.mrb[0].mxu1 %vm589_vm0, %v6468_v55 }
 0x173   : > { %5055 = vmatprep.mubr.msk.f32.mxu0 %vm589_vm0, %v6506_v25  ;;  %5220 = vmatprep.mubr.msk.f32.mxu1 %vm589_vm0, %v6506_v25 }
 0x176   : > { %5056 = vmatmul.mubr.msk.f32.gmra.mrb[46].mxu0 %vm589_vm0, %v6498_v20  ;;  %5221 = vmatmul.mubr.msk.f32.gmra.mrb[2].mxu1 %vm589_vm0, %v6498_v20 }
 0x177   : > { %5058 = vmatprep.mubr.msk.f32.mxu0 %vm589_vm0, %v6541_v52  ;;  %5223 = vmatprep.mubr.msk.f32.mxu1 %vm589_vm0, %v6541_v52 }
 0x17a   : > { %5059 = vmatmul.mubr.msk.f32.gmra.mrb[48].mxu0 %vm589_vm0, %v6533_v45  ;;  %5224 = vmatmul.mubr.msk.f32.gmra.mrb[4].mxu1 %vm589_vm0, %v6533_v45 }
 0x17b   : > { %5061 = vmatprep.mubr.msk.f32.mxu0 %vm589_vm0, %v6571_v18  ;;  %5226 = vmatprep.mubr.msk.f32.mxu1 %vm589_vm0, %v6571_v18 }
 0x17e   : > { %5062 = vmatmul.mubr.msk.f32.gmra.mrb[50].mxu0 %vm589_vm0, %v6563_v8  ;;  %5227 = vmatmul.mubr.msk.f32.gmra.mrb[6].mxu1 %vm589_vm0, %v6563_v8 }
 0x17f   : > { %5064 = vmatprep.mubr.msk.f32.mxu0 %vm589_vm0, %v6600_v47  ;;  %5229 = vmatprep.mubr.msk.f32.mxu1 %vm589_vm0, %v6600_v47 }
 0x182   : > { %5065 = vmatmul.mubr.msk.f32.gmra.mrb[52].mxu0 %vm589_vm0, %v6592_v38  ;;  %5230 = vmatmul.mubr.msk.f32.gmra.mrb[8].mxu1 %vm589_vm0, %v6592_v38 }
 0x183   : > { %5067 = vmatprep.mubr.msk.f32.mxu0 %vm589_vm0, %v6628_v28  ;;  %5232 = vmatprep.mubr.msk.f32.mxu1 %vm589_vm0, %v6628_v28 }
 0x186   : > { %5068 = vmatmul.mubr.msk.f32.gmra.mrb[54].mxu0 %vm589_vm0, %v6620_v11  ;;  %5233 = vmatmul.mubr.msk.f32.gmra.mrb[10].mxu1 %vm589_vm0, %v6620_v11 }
 0x187   : > { %5070 = vmatprep.mubr.msk.f32.mxu0 %vm589_vm0, %v6656_v7  ;;  %5235 = vmatprep.mubr.msk.f32.mxu1 %vm589_vm0, %v6656_v7 }
 0x18a   : > { %5071 = vmatmul.mubr.msk.f32.gmra.mrb[56].mxu0 %vm589_vm0, %v6648_v4  ;;  %5236 = vmatmul.mubr.msk.f32.gmra.mrb[12].mxu1 %vm589_vm0, %v6648_v4 }
 0x18b   : > { %5073 = vmatprep.mubr.msk.f32.mxu0 %vm589_vm0, %v6684_v6  ;;  %5238 = vmatprep.mubr.msk.f32.mxu1 %vm589_vm0, %v6684_v6 }
 0x18e   : > { %5074 = vmatmul.mubr.msk.f32.gmra.mrb[58].mxu0 %vm589_vm0, %v6676_v35  ;;  %5239 = vmatmul.mubr.msk.f32.gmra.mrb[14].mxu1 %vm589_vm0, %v6676_v35 }
 0x18f   : > { %5076 = vmatprep.mubr.msk.f32.mxu0 %vm589_vm0, %v6711_v39  ;;  %5241 = vmatprep.mubr.msk.f32.mxu1 %vm589_vm0, %v6711_v39 }
 0x192   : > { %5077 = vmatmul.mubr.msk.f32.gmra.mrb[60].mxu0 %vm589_vm0, %v6704_v37  ;;  %5242 = vmatmul.mubr.msk.f32.gmra.mrb[16].mxu1 %vm589_vm0, %v6704_v37 }
 0x193   : > { %5079 = vmatprep.mubr.msk.f32.mxu0 %vm589_vm0, %v6736_v53  ;;  %5244 = vmatprep.mubr.msk.f32.mxu1 %vm589_vm0, %v6736_v53 }
 0x196   : > { %5080 = vmatmul.mubr.msk.f32.gmra.mrb[62].mxu0 %vm589_vm0, %v6730_v41  ;;  %5245 = vmatmul.mubr.msk.f32.gmra.mrb[18].mxu1 %vm589_vm0, %v6730_v41 }
 0x197   : > { %5247 = vmatprep.mubr.msk.f32.mxu1 %vm589_vm0, %v6760_v22  ;;  %5090 = vmatprep.mubr.msk.f32.mxu0 %vm589_vm0, %v706_v0  ;;  %v745_v0 = vsel %vm668_vm4, 0.0, %v725_v49  ;;  %v692_v49 = vrot.slane %v6444_v40, 1 }
 0x19a   : > { %5091 = vmatmul.mubr.msk.f32.vlgmr.msra.gmra.mrb[32].mxu0 %vm589_vm0, %v743_v21  ;;  %5248 = vmatmul.mubr.msk.f32.gmra.mrb[20].mxu1 %vm589_vm0, %v6754_v50 }
 0x19b   : > { %5093 = vmatprep.mubr.msk.f32.mxu0 %vm589_vm0, %v707_v46  ;;  %5258 = vmatprep.mubr.msk.f32.mxu1 %vm589_vm0, %v707_v46  ;;  %v674_v46 = vrot.slane %v6452_v44, 1 }
 0x19c   : > { %5589 = vmatpush3.bf16.msra.mxu0 %v6301_v10  ;;  %v690_v10 = vrot.slane %v6396_v9, 1  ;;  %v7000_v9 = vsel %vm668_vm4, 0.0, %v726_v57  ;;  %v676_v57 = vrot.slane %v6506_v25, 1 }
 0x19d   : > { %5591 = vmatprep.subr.bf16.mxu0 %v6311_v13  ;;  %v7052_v44 = vsel %vm705_vm3, %v674_v46, %v692_v49  ;;  %v729_v40 = vsel %vm705_vm3, %v692_v49, %v674_v46  ;;  %v678_v49 = vrot.slane %v6571_v18, 1 }
 0x19e   : > { %5094 = vmatmul.mubr.msk.f32.gmra.mrb[34].mxu0 %vm589_vm0, %v745_v0  ;;  %5259 = vmatmul.mubr.msk.f32.vlgmr.msra.gmra.mrb[22].mxu1 %vm589_vm0, %v745_v0  ;;  %v727_v21 = vsel %vm705_vm3, %v690_v10, %v672_v1  ;;  %v7064_v0 = vsel %vm668_vm4, 0.0, %v729_v40  ;;  %v696_v40 = vrot.slane %v6563_v8, 1 }
 0x19f   : > { %5613 = vmatpush3.bf16.msra.mxu1 %v6826_v36  ;;  %5096 = vmatprep.mubr.msk.f32.mxu0 %vm589_vm0, %v6981_v61  ;;  %v7011_v36 = vsel %vm705_vm3, %v672_v1, %v690_v10  ;;  %v694_v1 = vrot.slane %v6498_v20, 1 }
 0x1a0   : > { %5261 = vmatprep.mubr.msk.f32.mxu1 %vm589_vm0, %v6981_v61  ;;  %5615 = vmatprep.subr.bf16.mxu1 %v5614_v27 }
 0x1a1   : > { %5593 = vmatpush3.bf16.msra.mxu0 %v6311_v13  ;;  %v7023_v13 = vsel %vm668_vm4, 0.0, %v727_v21  ;;  %v7092_v54 = vsel %vm705_vm3, %v676_v57, %v694_v1  ;;  %v731_v23 = vsel %vm705_vm3, %v694_v1, %v676_v57  ;;  %v677_v21 = vrot.slane %v6541_v52, 1 }
 0x1a2   : > { %5097 = vmatmul.mubr.msk.f32.gmra.mrb[36].mxu0 %vm589_vm0, %v7000_v9  ;;  %5262 = vmatmul.mubr.msk.f32.gmra.mrb[24].mxu1 %vm589_vm0, %v7000_v9  ;;  %v7104_v12 = vsel %vm668_vm4, 0.0, %v731_v23  ;;  %v679_v57 = vrot.slane %v6600_v47, 1  ;;  %v697_v1 = vrot.slane %v6592_v38, 1 }
 0x1a3   : > { %5099 = vmatprep.mubr.msk.f32.mxu0 %vm589_vm0, %v7011_v36  ;;  %5264 = vmatprep.mubr.msk.f32.mxu1 %vm589_vm0, %v7011_v36  ;;  %v7112_v30 = vsel %vm705_vm3, %v677_v21, %v695_v63  ;;  %v732_v46 = vsel %vm705_vm3, %v695_v63, %v677_v21 }
 0x1a4   : > { %5617 = vmatpush3.bf16.msra.mxu1 %v5614_v27  ;;  %v693_v27 = vrot.slane %v6468_v55, 1  ;;  %v7152_v21 = vsel %vm705_vm3, %v679_v57, %v697_v1  ;;  %v734_v63 = vsel %vm705_vm3, %v697_v1, %v679_v57  ;;  %v681_v1 = vrot.slane %v6656_v7, 1 }
 0x1a5   : > { %5619 = vmatprep.subr.bf16.mxu1 %v7003_v15  ;;  %7877 = vst [vmem:[#allocation21_spill] sm:$0xff] %v7152_v21 }
 0x1a6   : > { %5100 = vmatmul.mubr.msk.f32.gmra.mrb[38].mxu0 %vm589_vm0, %v7023_v13  ;;  %5265 = vmatmul.mubr.msk.f32.gmra.mrb[26].mxu1 %vm589_vm0, %v7023_v13  ;;  %v7072_v62 = vsel %vm705_vm3, %v675_v16, %v693_v27  ;;  %v730_v55 = vsel %vm705_vm3, %v693_v27, %v675_v16  ;;  %v7124_v16 = vsel %vm668_vm4, 0.0, %v732_v46  ;;  %v7132_v27 = vsel %vm705_vm3, %v678_v49, %v696_v40 }
 0x1a7   : > { %5102 = vmatprep.mubr.msk.f32.mxu0 %vm589_vm0, %v7032_v26  ;;  %5267 = vmatprep.mubr.msk.f32.mxu1 %vm589_vm0, %v7032_v26  ;;  %v7084_v10 = vsel %vm668_vm4, 0.0, %v730_v55  ;;  %v733_v55 = vsel %vm705_vm3, %v696_v40, %v678_v49  ;;  %v680_v46 = vrot.slane %v6628_v28, 1  ;;  %v698_v49 = vrot.slane %v6620_v11, 1 }
 0x1a8   : > { %v7144_v23 = vsel %vm668_vm4, 0.0, %v733_v55  ;;  %v7164_v40 = vsel %vm668_vm4, 0.0, %v734_v63 }
 0x1a9   : > { %7878 = vst [vmem:[#allocation22_spill] sm:$0xff] %v7164_v40  ;;  %v7172_v55 = vsel %vm705_vm3, %v680_v46, %v698_v49  ;;  %v735_v57 = vsel %vm705_vm3, %v698_v49, %v680_v46 }
 0x1aa   : > { %5103 = vmatmul.mubr.msk.f32.gmra.mrb[40].mxu0 %vm589_vm0, %v7044_v31  ;;  %5268 = vmatmul.mubr.msk.f32.gmra.mrb[28].mxu1 %vm589_vm0, %v7044_v31  ;;  %7879 = vst [vmem:[#allocation23_spill] sm:$0xff] %v7172_v55  ;;  %v7184_v63 = vsel %vm668_vm4, 0.0, %v735_v57 }
 0x1ab   : > { %5105 = vmatprep.mubr.msk.f32.mxu0 %vm589_vm0, %v7052_v44  ;;  %5270 = vmatprep.mubr.msk.f32.mxu1 %vm589_vm0, %v7052_v44  ;;  %7880 = vst [vmem:[#allocation24_spill] sm:$0xff] %v7184_v63 }
 0x1ae   : > { %5106 = vmatmul.mubr.msk.f32.gmra.mrb[42].mxu0 %vm589_vm0, %v7064_v0  ;;  %5271 = vmatmul.mubr.msk.f32.gmra.mrb[30].mxu1 %vm589_vm0, %v7064_v0 }
 0x1af   : > { %5108 = vmatprep.mubr.msk.f32.mxu0 %vm589_vm0, %v7072_v62  ;;  %5273 = vmatprep.mubr.msk.f32.mxu1 %vm589_vm0, %v7072_v62 }
 0x1b2   : > { %5109 = vmatmul.mubr.msk.f32.gmra.mrb[44].mxu0 %vm589_vm0, %v7084_v10  ;;  %5274 = vmatmul.mubr.msk.f32.gmra.mrb[0].mxu1 %vm589_vm0, %v7084_v10 }
 0x1b3   : > { %5111 = vmatprep.mubr.msk.f32.mxu0 %vm589_vm0, %v7092_v54  ;;  %5276 = vmatprep.mubr.msk.f32.mxu1 %vm589_vm0, %v7092_v54 }
 0x1b6   : > { %5112 = vmatmul.mubr.msk.f32.gmra.mrb[46].mxu0 %vm589_vm0, %v7104_v12  ;;  %5277 = vmatmul.mubr.msk.f32.gmra.mrb[2].mxu1 %vm589_vm0, %v7104_v12 }
 0x1b7   : > { %5114 = vmatprep.mubr.msk.f32.mxu0 %vm589_vm0, %v7112_v30  ;;  %5279 = vmatprep.mubr.msk.f32.mxu1 %vm589_vm0, %v7112_v30 }
 0x1ba   : > { %5115 = vmatmul.mubr.msk.f32.gmra.mrb[48].mxu0 %vm589_vm0, %v7124_v16  ;;  %5280 = vmatmul.mubr.msk.f32.gmra.mrb[4].mxu1 %vm589_vm0, %v7124_v16 }
 0x1bb   : > { %5117 = vmatprep.mubr.msk.f32.mxu0 %vm589_vm0, %v7132_v27  ;;  %5282 = vmatprep.mubr.msk.f32.mxu1 %vm589_vm0, %v7132_v27 }
 0x1be   : > { %5118 = vmatmul.mubr.msk.f32.gmra.mrb[50].mxu0 %vm589_vm0, %v7144_v23  ;;  %5283 = vmatmul.mubr.msk.f32.gmra.mrb[6].mxu1 %vm589_vm0, %v7144_v23 }
 0x1bf   : > { %5120 = vmatprep.mubr.msk.f32.mxu0 %vm589_vm0, %v7152_v21  ;;  %5285 = vmatprep.mubr.msk.f32.mxu1 %vm589_vm0, %v7152_v21  ;;  %v699_v21 = vrot.slane %v6648_v4, 1 }
 0x1c1   : > { %v7192_v46 = vsel %vm705_vm3, %v681_v1, %v699_v21  ;;  %v736_v49 = vsel %vm705_vm3, %v699_v21, %v681_v1 }
 0x1c2   : > { %5121 = vmatmul.mubr.msk.f32.gmra.mrb[52].mxu0 %vm589_vm0, %v7164_v40  ;;  %5286 = vmatmul.mubr.msk.f32.gmra.mrb[8].mxu1 %vm589_vm0, %v7164_v40  ;;  %7881 = vst [vmem:[#allocation25_spill] sm:$0xff] %v7192_v46  ;;  %v682_v40 = vrot.slane %v6684_v6, 1  ;;  %v7204_v57 = vsel %vm668_vm4, 0.0, %v736_v49 }
 0x1c3   : > { %5123 = vmatprep.mubr.msk.f32.mxu0 %vm589_vm0, %v7172_v55  ;;  %5288 = vmatprep.mubr.msk.f32.mxu1 %vm589_vm0, %v7172_v55  ;;  %v700_v55 = vrot.slane %v6676_v35, 1  ;;  %7882 = vst [vmem:[#allocation26_spill] sm:$0xff] %v7204_v57 }
 0x1c5   : > { %v7212_v21 = vsel %vm705_vm3, %v682_v40, %v700_v55  ;;  %v737_v1 = vsel %vm705_vm3, %v700_v55, %v682_v40 }
 0x1c6   : > { %5124 = vmatmul.mubr.msk.f32.gmra.mrb[54].mxu0 %vm589_vm0, %v7184_v63  ;;  %5289 = vmatmul.mubr.msk.f32.gmra.mrb[10].mxu1 %vm589_vm0, %v7184_v63  ;;  %7883 = vst [vmem:[#allocation27_spill] sm:$0xff] %v7212_v21  ;;  %v683_v63 = vrot.slane %v6711_v39, 1  ;;  %v7224_v49 = vsel %vm668_vm4, 0.0, %v737_v1 }
 0x1c7   : > { %5126 = vmatprep.mubr.msk.f32.mxu0 %vm589_vm0, %v7192_v46  ;;  %5291 = vmatprep.mubr.msk.f32.mxu1 %vm589_vm0, %v7192_v46  ;;  %v701_v46 = vrot.slane %v6704_v37, 1  ;;  %7884 = vst [vmem:[#allocation28_spill] sm:$0xff] %v7224_v49 }
 0x1c9   : > { %v7232_v40 = vsel %vm705_vm3, %v683_v63, %v701_v46  ;;  %v738_v55 = vsel %vm705_vm3, %v701_v46, %v683_v63 }
 0x1ca   : > { %5127 = vmatmul.mubr.msk.f32.gmra.mrb[56].mxu0 %vm589_vm0, %v7204_v57  ;;  %5292 = vmatmul.mubr.msk.f32.gmra.mrb[12].mxu1 %vm589_vm0, %v7204_v57  ;;  %7885 = vst [vmem:[#allocation29_spill] sm:$0xff] %v7232_v40  ;;  %v684_v57 = vrot.slane %v6736_v53, 1  ;;  %v7244_v1 = vsel %vm668_vm4, 0.0, %v738_v55 }
 0x1cb   : > { %5129 = vmatprep.mubr.msk.f32.mxu0 %vm589_vm0, %v7212_v21  ;;  %5294 = vmatprep.mubr.msk.f32.mxu1 %vm589_vm0, %v7212_v21  ;;  %v702_v21 = vrot.slane %v6730_v41, 1 }
 0x1cd   : > { %v7252_v63 = vsel %vm705_vm3, %v684_v57, %v702_v21  ;;  %v739_v46 = vsel %vm705_vm3, %v702_v21, %v684_v57 }
 0x1ce   : > { %5130 = vmatmul.mubr.msk.f32.gmra.mrb[58].mxu0 %vm589_vm0, %v7224_v49  ;;  %5295 = vmatmul.mubr.msk.f32.gmra.mrb[14].mxu1 %vm589_vm0, %v7224_v49  ;;  %7886 = vst [vmem:[#allocation30_spill] sm:$0xff] %v7252_v63  ;;  %v685_v49 = vrot.slane %v6760_v22, 1  ;;  %v7264_v55 = vsel %vm668_vm4, 0.0, %v739_v46 }
 0x1cf   : > { %5132 = vmatprep.mubr.msk.f32.mxu0 %vm589_vm0, %v7232_v40  ;;  %5297 = vmatprep.mubr.msk.f32.mxu1 %vm589_vm0, %v7232_v40  ;;  %v703_v40 = vrot.slane %v6754_v50, 1  ;;  %7887 = vst [vmem:[#allocation31_spill] sm:$0xff] %v7264_v55 }
 0x1d1   : > { %v7272_v57 = vsel %vm705_vm3, %v685_v49, %v703_v40  ;;  %v740_v21 = vsel %vm705_vm3, %v703_v40, %v685_v49  ;;  %v4407_v49 = vld [vmem:[%s7829_s3 + $0x108] sm:$0xff]  ;;  %v7899_v40 = vld [vmem:[#allocation17_spill] sm:$0xff] }
 0x1d2   : > { %5133 = vmatmul.mubr.msk.f32.gmra.mrb[60].mxu0 %vm589_vm0, %v7244_v1  ;;  %5298 = vmatmul.mubr.msk.f32.gmra.mrb[16].mxu1 %vm589_vm0, %v7244_v1  ;;  %v7282_v46 = vsel %vm668_vm4, 0.0, %v740_v21  ;;  %v7900_v21 = vld [vmem:[#allocation18_spill] sm:$0xff] }
 0x1d3   : > { %5135 = vmatprep.mubr.msk.f32.mxu0 %vm589_vm0, %v7252_v63  ;;  %5300 = vmatprep.mubr.msk.f32.mxu1 %vm589_vm0, %v7252_v63  ;;  %v4373_v63 = vld [vmem:[%s7829_s3 + $0xf8] sm:$0xff] }
 0x1d6   : > { %5136 = vmatmul.mubr.msk.f32.gmra.mrb[62].mxu0 %vm589_vm0, %v7264_v55  ;;  %5301 = vmatmul.mubr.msk.f32.gmra.mrb[18].mxu1 %vm589_vm0, %v7264_v55  ;;  %v4372_v55 = vld [vmem:[%s7829_s3 + $0xf0] sm:$0xff] }
 0x1d7   : > { %5146 = vmatprep.mubr.msk.f32.mxu0 %vm589_vm0, %v6378_v60  ;;  %5303 = vmatprep.mubr.msk.f32.mxu1 %vm589_vm0, %v7272_v57  ;;  %v5622_v60 = vpack.c.bf16 %v4373_v63, %v4372_v55 }
 0x1da   : > { %5147 = vmatmul.mubr.msk.f32.vlgmr.msra.gmra.mrb[32].mxu0 %vm589_vm0, %v6389_v3  ;;  %5304 = vmatmul.mubr.msk.f32.gmra.mrb[20].mxu1 %vm589_vm0, %v7282_v46  ;;  %v4406_v3 = vld [vmem:[%s7829_s3 + $0x100] sm:$0xff] }
 0x1db   : > { %5149 = vmatprep.mubr.msk.f32.mxu0 %vm589_vm0, %v6402_v14  ;;  %5314 = vmatprep.mubr.msk.f32.mxu1 %vm589_vm0, %v6402_v14  ;;  %v5626_v14 = vpack.c.bf16 %v4407_v49, %v4406_v3  ;;  %v7902_v49 = vld [vmem:[#allocation20_spill] sm:$0xff] }
 0x1de   : > { %5150 = vmatmul.mubr.msk.f32.gmra.mrb[34].mxu0 %vm589_vm0, %v6413_v19  ;;  %5315 = vmatmul.mubr.msk.f32.vlgmr.msra.gmra.mrb[22].mxu1 %vm589_vm0, %v6413_v19  ;;  %v7888_v19 = vld [vmem:[#allocation6_spill] sm:$0xff] }
 0x1df   : > { %5621 = vmatpush3.bf16.msra.mxu1 %v7003_v15  ;;  %5152 = vmatprep.mubr.msk.f32.mxu0 %vm589_vm0, %v6426_v29  ;;  %v7367_v15 = vld [vmem:[#allocation2 + $0x118] sm:$0xff] }
 0x1e0   : > { %5317 = vmatprep.mubr.msk.f32.mxu1 %vm589_vm0, %v6426_v29  ;;  %5623 = vmatprep.subr.bf16.mxu1 %v5622_v60  ;;  %v7889_v29 = vld [vmem:[#allocation7_spill] sm:$0xff]  ;;  %v815_v55 = vrot.slane %v7367_v15, 7 }
 0x1e2   : > { %5153 = vmatmul.mubr.msk.f32.gmra.mrb[36].mxu0 %vm589_vm0, %v6437_v33  ;;  %5318 = vmatmul.mubr.msk.f32.gmra.mrb[24].mxu1 %vm589_vm0, %v6437_v33  ;;  %v7890_v33 = vld [vmem:[#allocation8_spill] sm:$0xff] }
 0x1e3   : > { %5155 = vmatprep.mubr.msk.f32.mxu0 %vm589_vm0, %v6450_v43  ;;  %5320 = vmatprep.mubr.msk.f32.mxu1 %vm589_vm0, %v6450_v43  ;;  %v7891_v43 = vld [vmem:[#allocation9_spill] sm:$0xff] }
 0x1e4   : > { %5625 = vmatpush3.bf16.msra.mxu1 %v5622_v60  ;;  %v7901_v60 = vld [vmem:[#allocation19_spill] sm:$0xff] }
 0x1e5   : > { %5627 = vmatprep.subr.bf16.mxu1 %v5626_v14 }
 0x1e6   : > { %5156 = vmatmul.mubr.msk.f32.gmra.mrb[38].mxu0 %vm589_vm0, %v6461_v48  ;;  %5321 = vmatmul.mubr.msk.f32.gmra.mrb[26].mxu1 %vm589_vm0, %v6461_v48  ;;  %v7892_v48 = vld [vmem:[#allocation10_spill] sm:$0xff] }
 0x1e7   : > { %5158 = vmatprep.mubr.msk.f32.mxu0 %vm589_vm0, %v6474_v59  ;;  %5323 = vmatprep.mubr.msk.f32.mxu1 %vm589_vm0, %v6474_v59  ;;  %v7893_v59 = vld [vmem:[#allocation11_spill] sm:$0xff] }
 0x1ea   : > { %5159 = vmatmul.mubr.msk.f32.gmra.mrb[40].mxu0 %vm589_vm0, %v6485_v5  ;;  %5324 = vmatmul.mubr.msk.f32.gmra.mrb[28].mxu1 %vm589_vm0, %v6485_v5  ;;  %v7894_v5 = vld [vmem:[#allocation12_spill] sm:$0xff] }
 0x1eb   : > { %5326 = vmatprep.mubr.msk.f32.mxu1 %vm589_vm0, %v6504_v24  ;;  %v7895_v24 = vld [vmem:[#allocation13_spill] sm:$0xff] }
 0x1ee   : > { %5327 = vmatmul.mubr.msk.f32.gmra.mrb[30].mxu1 %vm589_vm0, %v6517_v32  ;;  %v7896_v32 = vld [vmem:[#allocation14_spill] sm:$0xff] }
 0x1ef   : > { %5329 = vmatprep.mubr.msk.f32.mxu1 %vm589_vm0, %v6539_v51  ;;  %v7897_v51 = vld [vmem:[#allocation15_spill] sm:$0xff] }
 0x1f2   : > { %5330 = vmatmul.mubr.msk.f32.gmra.mrb[0].mxu1 %vm589_vm0, %v6554_v56  ;;  %v7898_v56 = vld [vmem:[#allocation16_spill] sm:$0xff] }
 0x1f3   : > { %5332 = vmatprep.mubr.msk.f32.mxu1 %vm589_vm0, %v6569_v17  ;;  %v7365_v17 = vld [vmem:[#allocation2 + $0x110] sm:$0xff] }
 0x1f4   : > { %v797_v63 = vrot.slane %v7365_v17, 7 }
 0x1f6   : > { %5333 = vmatmul.mubr.msk.f32.gmra.mrb[2].mxu1 %vm589_vm0, %v7888_v19  ;;  %v852_v3 = vsel %vm816_vm1, %v815_v55, %v797_v63 }
 0x1f7   : > { %5335 = vmatprep.mubr.msk.f32.mxu1 %vm589_vm0, %v7889_v29  ;;  %v887_v19 = vsel %vm778_vm2, 0.0, %v852_v3  ;;  %v834_v29 = vsel %vm816_vm1, %v797_v63, %v815_v55 }
 0x1fa   : > { %5336 = vmatmul.mubr.msk.f32.gmra.mrb[4].mxu1 %vm589_vm0, %v7890_v33  ;;  %v4408_v33 = vld [vmem:[%s7829_s3 + $0x110] sm:$0xff] }
 0x1fb   : > { %5338 = vmatprep.mubr.msk.f32.mxu1 %vm589_vm0, %v7891_v43  ;;  %v4409_v43 = vld [vmem:[%s7829_s3 + $0x118] sm:$0xff] }
 0x1fe   : > { %5339 = vmatmul.mubr.msk.f32.gmra.mrb[6].mxu1 %vm589_vm0, %v7892_v48  ;;  %v5630_v48 = vpack.c.bf16 %v4409_v43, %v4408_v33 }
 0x1ff   : > { %5341 = vmatprep.mubr.msk.f32.mxu1 %vm589_vm0, %v7893_v59  ;;  %v5978_v59 = vld [vmem:[#allocation2 + $0x30] sm:$0xff] }
 0x202   : > { %5342 = vmatmul.mubr.msk.f32.gmra.mrb[8].mxu1 %vm589_vm0, %v7894_v5  ;;  %v5979_v5 = vld [vmem:[#allocation2 + $0x38] sm:$0xff] }
 0x203   : > { %5344 = vmatprep.mubr.msk.f32.mxu1 %vm589_vm0, %v7895_v24  ;;  %v5980_v24 = vld [vmem:[#allocation2 + $0x40] sm:$0xff] }
 0x206   : > { %5345 = vmatmul.mubr.msk.f32.gmra.mrb[10].mxu1 %vm589_vm0, %v7896_v32  ;;  %v5981_v32 = vld [vmem:[#allocation2 + $0x48] sm:$0xff] }
 0x207   : > { %5347 = vmatprep.mubr.msk.f32.mxu1 %vm589_vm0, %v7897_v51  ;;  %v5982_v51 = vld [vmem:[#allocation2 + $0x50] sm:$0xff] }
 0x20a   : > { %5348 = vmatmul.mubr.msk.f32.gmra.mrb[12].mxu1 %vm589_vm0, %v7898_v56  ;;  %v5983_v56 = vld [vmem:[#allocation2 + $0x58] sm:$0xff] }
 0x20b   : > { %5350 = vmatprep.mubr.msk.f32.mxu1 %vm589_vm0, %v7899_v40  ;;  %v5985_v40 = vld [vmem:[#allocation2 + $0x68] sm:$0xff] }
 0x20e   : > { %5351 = vmatmul.mubr.msk.f32.gmra.mrb[14].mxu1 %vm589_vm0, %v7900_v21 }
 0x20f   : > { %5353 = vmatprep.mubr.msk.f32.mxu1 %vm589_vm0, %v7901_v60 }
 0x212   : > { %5354 = vmatmul.mubr.msk.f32.gmra.mrb[16].mxu1 %vm589_vm0, %v7902_v49 }
 0x213   : > { %5356 = vmatprep.mubr.msk.f32.mxu1 %vm589_vm0, %v6788_v34  ;;  %v5976_v34 = vld [vmem:[#allocation2 + $0x20] sm:$0xff] }
 0x216   : > { %5357 = vmatmul.mubr.msk.f32.gmra.mrb[18].mxu1 %vm589_vm0, %v6794_v58  ;;  %v5977_v58 = vld [vmem:[#allocation2 + $0x28] sm:$0xff] }
 0x217   : > { %5359 = vmatprep.mubr.msk.f32.mxu1 %vm589_vm0, %v887_v19 }
 0x21a   : > { %5360 = vmatmul.mubr.msk.f32.gmra.mrb[20].mxu1 %vm589_vm0, %v834_v29 }
 0x21b   : > { %5370 = vmatprep.mubr.msk.f32.mxu1 %vm589_vm0, %v5976_v34 }
 0x21e   : > { %5371 = vmatmul.mubr.msk.f32.vlgmr.msra.gmra.mrb[22].mxu1 %vm589_vm0, %v5977_v58 }
 0x21f   : > { %5629 = vmatpush3.bf16.msra.mxu1 %v5626_v14  ;;  %5373 = vmatprep.mubr.msk.f32.mxu1 %vm589_vm0, %v5978_v59  ;;  %v5984_v14 = vld [vmem:[#allocation2 + $0x60] sm:$0xff] }
 0x220   : > { %5631 = vmatprep.subr.bf16.mxu1 %v5630_v48 }
 0x222   : > { %5374 = vmatmul.mubr.msk.f32.gmra.mrb[24].mxu1 %vm589_vm0, %v5979_v5 }
 0x223   : > { %5376 = vmatprep.mubr.msk.f32.mxu1 %vm589_vm0, %v5980_v24  ;;  %5633 = vmatpush3.bf16.msra.mxu1 %v5630_v48  ;;  %v7580_v48 = vld [vmem:[%s7830_s4] ss:$0 sm:$0xff] }
 0x226   : > { %5377 = vmatmul.mubr.msk.f32.gmra.mrb[26].mxu1 %vm589_vm0, %v5981_v32 }
 0x227   : > { %5379 = vmatprep.mubr.msk.f32.mxu1 %vm589_vm0, %v5982_v51 }
 0x22a   : > { %5380 = vmatmul.mubr.msk.f32.gmra.mrb[28].mxu1 %vm589_vm0, %v5983_v56 }
 0x22b   : > { %5382 = vmatprep.mubr.msk.f32.mxu1 %vm589_vm0, %v5984_v14 }
 0x22e   : > { %5383 = vmatmul.mubr.msk.f32.gmra.mrb[30].mxu1 %vm589_vm0, %v5985_v40 }
 0x22f   : > { %5385 = vmatprep.mubr.msk.f32.mxu1 %vm589_vm0, %v6506_v25  ;;  %v3610_v25 = vld [vmem:[%s7831_s5 + $0x8] sm:$0xff] }
 0x232   : > { %5386 = vmatmul.mubr.msk.f32.gmra.mrb[0].mxu1 %vm589_vm0, %v6498_v20  ;;  %v3609_v20 = vld [vmem:[%s7831_s5] sm:$0xff] }
 0x233   : > { %5388 = vmatprep.mubr.msk.f32.mxu1 %vm589_vm0, %v6541_v52  ;;  %v5634_v52 = vpack.c.bf16 %v3610_v25, %v3609_v20 }
 0x235   : > { %5635 = vmatprep.subr.bf16.mxu0 %v5634_v52 }
 0x236   : > { %5389 = vmatmul.mubr.msk.f32.gmra.mrb[2].mxu1 %vm589_vm0, %v6533_v45  ;;  %v3611_v45 = vld [vmem:[%s7831_s5 + $0x10] sm:$0xff]  ;;  %5637 = vmatpush3.bf16.msra.mxu0 %v5634_v52 }
 0x237   : > { %5391 = vmatprep.mubr.msk.f32.mxu1 %vm589_vm0, %v6571_v18 }
 0x23a   : > { %5392 = vmatmul.mubr.msk.f32.gmra.mrb[4].mxu1 %vm589_vm0, %v6563_v8  ;;  %v3612_v8 = vld [vmem:[%s7831_s5 + $0x18] sm:$0xff] }
 0x23b   : > { %5394 = vmatprep.mubr.msk.f32.mxu1 %vm589_vm0, %v6600_v47  ;;  %v5638_v18 = vpack.c.bf16 %v3612_v8, %v3611_v45  ;;  %v7904_v47 = vld [vmem:[#allocation22_spill] sm:$0xff] }
 0x23d   : > { %5639 = vmatprep.subr.bf16.mxu0 %v5638_v18 }
 0x23e   : > { %5395 = vmatmul.mubr.msk.f32.gmra.mrb[6].mxu1 %vm589_vm0, %v6592_v38  ;;  %5641 = vmatpush3.bf16.msra.mxu0 %v5638_v18  ;;  %v7903_v38 = vld [vmem:[#allocation21_spill] sm:$0xff] }
 0x23f   : > { %5397 = vmatprep.mubr.msk.f32.mxu1 %vm589_vm0, %v6628_v28 }
 0x242   : > { %5398 = vmatmul.mubr.msk.f32.gmra.mrb[8].mxu1 %vm589_vm0, %v6620_v11  ;;  %v7905_v11 = vld [vmem:[#allocation23_spill] sm:$0xff] }
 0x243   : > { %5400 = vmatprep.mubr.msk.f32.mxu1 %vm589_vm0, %v6656_v7 }
 0x246   : > { %5401 = vmatmul.mubr.msk.f32.gmra.mrb[10].mxu1 %vm589_vm0, %v6648_v4  ;;  %v7907_v4 = vld [vmem:[#allocation25_spill] sm:$0xff] }
 0x247   : > { %5403 = vmatprep.mubr.msk.f32.mxu1 %vm589_vm0, %v6684_v6 }
 0x24a   : > { %5404 = vmatmul.mubr.msk.f32.gmra.mrb[12].mxu1 %vm589_vm0, %v6676_v35  ;;  %v7906_v35 = vld [vmem:[#allocation24_spill] sm:$0xff] }
 0x24b   : > { %5406 = vmatprep.mubr.msk.f32.mxu1 %vm589_vm0, %v6711_v39 }
 0x24e   : > { %5407 = vmatmul.mubr.msk.f32.gmra.mrb[14].mxu1 %vm589_vm0, %v6704_v37 }
 0x24f   : > { %5409 = vmatprep.mubr.msk.f32.mxu1 %vm589_vm0, %v6736_v53  ;;  %v7909_v53 = vld [vmem:[#allocation27_spill] sm:$0xff] }
 0x252   : > { %5410 = vmatmul.mubr.msk.f32.gmra.mrb[16].mxu1 %vm589_vm0, %v6730_v41  ;;  %v7910_v41 = vld [vmem:[#allocation28_spill] sm:$0xff] }
 0x253   : > { %5412 = vmatprep.mubr.msk.f32.mxu1 %vm589_vm0, %v6760_v22 }
 0x256   : > { %5413 = vmatmul.mubr.msk.f32.gmra.mrb[18].mxu1 %vm589_vm0, %v6754_v50  ;;  %v7908_v50 = vld [vmem:[#allocation26_spill] sm:$0xff] }
 0x257   : > { %5415 = vmatprep.mubr.msk.f32.mxu1 %vm589_vm0, %v7365_v17 }
 0x25a   : > { %5416 = vmatmul.mubr.msk.f32.gmra.mrb[20].mxu1 %vm589_vm0, %v7367_v15 }
 0x25b   : > { %5426 = vmatprep.mubr.msk.f32.mxu1 %vm589_vm0, %v6981_v61  ;;  %v7911_v61 = vld [vmem:[#allocation29_spill] sm:$0xff] }
 0x25e   : > { %5427 = vmatmul.mubr.msk.f32.vlgmr.msra.gmra.mrb[22].mxu1 %vm589_vm0, %v7000_v9 }
 0x25f   : > { %5429 = vmatprep.mubr.msk.f32.mxu1 %vm589_vm0, %v7011_v36 }
 0x262   : > { %5430 = vmatmul.mubr.msk.f32.gmra.mrb[24].mxu1 %vm589_vm0, %v7023_v13  ;;  %v7912_v13 = vld [vmem:[#allocation30_spill] sm:$0xff] }
 0x263   : > { %5432 = vmatprep.mubr.msk.f32.mxu1 %vm589_vm0, %v7032_v26  ;;  %v686_v26 = vrot.slane %v7365_v17, 1 }
 0x266   : > { %5433 = vmatmul.mubr.msk.f32.gmra.mrb[26].mxu1 %vm589_vm0, %v7044_v31  ;;  %v704_v31 = vrot.slane %v7367_v15, 1 }
 0x267   : > { %5435 = vmatprep.mubr.msk.f32.mxu1 %vm589_vm0, %v7052_v44 }
 0x26a   : > { %5436 = vmatmul.mubr.msk.f32.gmra.mrb[28].mxu1 %vm589_vm0, %v7064_v0 }
 0x26b   : > { %5438 = vmatprep.mubr.msk.f32.mxu1 %vm589_vm0, %v7072_v62  ;;  %v7913_v62 = vld [vmem:[#allocation31_spill] sm:$0xff] }
 0x26e   : > { %5439 = vmatmul.mubr.msk.f32.gmra.mrb[30].mxu1 %vm589_vm0, %v7084_v10  ;;  %v723_v10 = vsel %vm705_vm3, %v686_v26, %v704_v31 }
 0x26f   : > { %5441 = vmatprep.mubr.msk.f32.mxu1 %vm589_vm0, %v7092_v54  ;;  %v741_v54 = vsel %vm705_vm3, %v704_v31, %v686_v26 }
 0x272   : > { %5442 = vmatmul.mubr.msk.f32.gmra.mrb[0].mxu1 %vm589_vm0, %v7104_v12 }
 0x273   : > { %5444 = vmatprep.mubr.msk.f32.mxu1 %vm589_vm0, %v7112_v30 }
 0x276   : > { %5445 = vmatmul.mubr.msk.f32.gmra.mrb[2].mxu1 %vm589_vm0, %v7124_v16  ;;  %v777_v16 = vsel %vm668_vm4, 0.0, %v741_v54 }
 0x277   : > { %5447 = vmatprep.mubr.msk.f32.mxu1 %vm589_vm0, %v7132_v27 }
 0x27a   : > { %5448 = vmatmul.mubr.msk.f32.gmra.mrb[4].mxu1 %vm589_vm0, %v7144_v23 }
 0x27b   : > { %5450 = vmatprep.mubr.msk.f32.mxu1 %vm589_vm0, %v7903_v38 }
 0x27e   : > { %5451 = vmatmul.mubr.msk.f32.gmra.mrb[6].mxu1 %vm589_vm0, %v7904_v47 }
 0x27f   : > { %5453 = vmatprep.mubr.msk.f32.mxu1 %vm589_vm0, %v7905_v11 }
 0x281   : > { %v7501_v22 = vpop.f32.mrb[42].mxu0 }
 0x282   : > { %v7503_v28 = vpop.f32.mrb[43].mxu0  ;;  %5454 = vmatmul.mubr.msk.f32.gmra.mrb[8].mxu1 %vm589_vm0, %v7906_v35 }
 0x283   : > { %5456 = vmatprep.mubr.msk.f32.mxu1 %vm589_vm0, %v7907_v4 }
 0x285   : > { %v7509_v6 = vpop.f32.mrb[44].mxu0 }
 0x286   : > { %v7511_v7 = vpop.f32.mrb[45].mxu0  ;;  %5457 = vmatmul.mubr.msk.f32.gmra.mrb[10].mxu1 %vm589_vm0, %v7908_v50 }
 0x287   : > { %5459 = vmatprep.mubr.msk.f32.mxu1 %vm589_vm0, %v7909_v53 }
 0x289   : > { %v7517_v37 = vpop.f32.mrb[46].mxu0 }
 0x28a   : > { %v7519_v39 = vpop.f32.mrb[47].mxu0  ;;  %5460 = vmatmul.mubr.msk.f32.gmra.mrb[12].mxu1 %vm589_vm0, %v7910_v41 }
 0x28b   : > { %5462 = vmatprep.mubr.msk.f32.mxu1 %vm589_vm0, %v7911_v61 }
 0x28d   : > { %v7525_v9 = vpop.f32.mrb[48].mxu0 }
 0x28e   : > { %v7527_v36 = vpop.f32.mrb[49].mxu0  ;;  %5463 = vmatmul.mubr.msk.f32.gmra.mrb[14].mxu1 %vm589_vm0, %v7244_v1 }
 0x28f   : > { %5465 = vmatprep.mubr.msk.f32.mxu1 %vm589_vm0, %v7912_v13 }
 0x291   : > { %v7535_v44 = vpop.f32.mrb[50].mxu0 }
 0x292   : > { %v7537_v0 = vpop.f32.mrb[51].mxu0  ;;  %5466 = vmatmul.mubr.msk.f32.gmra.mrb[16].mxu1 %vm589_vm0, %v7913_v62 }
 0x293   : > { %5468 = vmatprep.mubr.msk.f32.mxu1 %vm589_vm0, %v7272_v57 }
 0x295   : > { %v7547_v12 = vpop.f32.mrb[52].mxu0 }
 0x296   : > { %v7549_v30 = vpop.f32.mrb[53].mxu0  ;;  %5469 = vmatmul.mubr.msk.f32.gmra.mrb[18].mxu1 %vm589_vm0, %v7282_v46 }
 0x297   : > { %5471 = vmatprep.mubr.msk.f32.mxu1 %vm589_vm0, %v723_v10 }
 0x299   : > { %v7556_v27 = vpop.f32.mrb[54].mxu0 }
 0x29a   : > { %v7558_v23 = vpop.f32.mrb[55].mxu0  ;;  %5472 = vmatmul.mubr.msk.f32.gmra.mrb[20].mxu1 %vm589_vm0, %v777_v16 }
 0x29d   : > { %v7561_v2 = vpop.f32.mrb[56].mxu0 }
 0x29e   : > { %v7563_v1 = vpop.f32.mrb[57].mxu0 }
 0x2a1   : > { %v7565_v57 = vpop.f32.mrb[58].mxu0 }
 0x2a2   : > { %v7567_v17 = vpop.f32.mrb[59].mxu0 }
 0x2a5   : > { %v7569_v46 = vpop.f32.mrb[60].mxu0 }
 0x2a6   : > { %v7571_v15 = vpop.f32.mrb[61].mxu0 }
 0x2a9   : > { %v7573_v42 = vpop.f32.mrb[62].mxu0 }
 0x2aa   : > { %v7575_v63 = vpop.f32.mrb[63].mxu0 }
 0x2ad   : > { %v5148_v55 = vpop.f32.mrb[32].mxu0 }
 0x2ae   : > { %v2046_v21 = vpop.f32.mrb[33].mxu0  ;;  %v5646_v58 = vadd.f32 %v5148_v55, %v7580_v48 }
 0x2af   : > { %v5648_v59 = vadd.f32 %v7580_v48, %v2046_v21 }
 0x2b1   : > { %v5151_v60 = vpop.f32.mrb[34].mxu0 }
 0x2b2   : > { %v2056_v3 = vpop.f32.mrb[35].mxu0  ;;  %v5650_v56 = vadd.f32 %v5151_v60, %v7580_v48 }
 0x2b3   : > { %v5652_v14 = vadd.f32 %v7580_v48, %v2056_v3 }
 0x2b5   : > { %v5154_v49 = vpop.f32.mrb[36].mxu0 }
 0x2b6   : > { %v2066_v19 = vpop.f32.mrb[37].mxu0  ;;  %v5654_v18 = vadd.f32 %v5154_v49, %v7580_v48 }
 0x2b7   : > { %v5656_v38 = vadd.f32 %v7580_v48, %v2066_v19 }
 0x2b9   : > { %v5157_v29 = vpop.f32.mrb[38].mxu0 }
 0x2ba   : > { %v2076_v33 = vpop.f32.mrb[39].mxu0  ;;  %v5658_v41 = vadd.f32 %v5157_v29, %v7580_v48 }
 0x2bb   : > { %v5660_v61 = vadd.f32 %v7580_v48, %v2076_v33  ;;  %v5666_v33 = vadd.f32 %v7501_v22, %v7580_v48  ;;  %v5672_v22 = vadd.f32 %v7580_v48, %v7511_v7 }
 0x2bd   : > { %v5160_v43 = vpop.f32.mrb[40].mxu0 }
 0x2be   : > { %v2086_v34 = vpop.f32.mrb[41].mxu0  ;;  %v5662_v16 = vadd.f32 %v5160_v43, %v7580_v48  ;;  %v5668_v43 = vadd.f32 %v7580_v48, %v7503_v28 }
 0x2bf   : > { %v5664_v55 = vadd.f32 %v7580_v48, %v2086_v34 }
 0x331   : > { %v5428_v5 = vpop.f32.mrb[22].mxu1 }
 0x332   : > { %v5647_v24 = vadd.f32 %v5646_v58, %v5428_v5  ;;  %v3386_v32 = vpop.f32.mrb[23].mxu1 }
 0x333   : > { %v5649_v51 = vadd.f32 %v5648_v59, %v3386_v32 }
 0x334   : > { %v3578_v25 = vmax.f32 %v5647_v24, 0.0 }
 0x335   : > { %v3577_v40 = vmax.f32 %v5649_v51, 0.0  ;;  %v5431_v20 = vpop.f32.mrb[24].mxu1  ;;  %v5670_v51 = vadd.f32 %v7509_v6, %v7580_v48  ;;  %v5676_v6 = vadd.f32 %v7580_v48, %v7519_v39 }
 0x336   : > { %v5651_v45 = vadd.f32 %v5650_v56, %v5431_v20  ;;  %v3396_v52 = vpop.f32.mrb[25].mxu1 }
 0x337   : > { %v5653_v8 = vadd.f32 %v5652_v14, %v3396_v52  ;;  %5482 = vmatprep.mubr.msk.f32.mxu0 %vm589_vm0, %v3577_v40 }
 0x338   : > { %5483 = vmatmul.mubr.msk.f32.vlgmr.msra.gmra.mrb[64].mxu0 %vm589_vm0, %v3578_v25  ;;  %v3580_v35 = vmax.f32 %v5651_v45, 0.0  ;;  %v5674_v45 = vadd.f32 %v7517_v37, %v7580_v48  ;;  %v5680_v37 = vadd.f32 %v7580_v48, %v7527_v36 }
 0x339   : > { %v3579_v47 = vmax.f32 %v5653_v8, 0.0  ;;  %v5434_v11 = vpop.f32.mrb[26].mxu1 }
 0x33a   : > { %v5655_v4 = vadd.f32 %v5654_v18, %v5434_v11  ;;  %v3406_v50 = vpop.f32.mrb[27].mxu1  ;;  %v5678_v11 = vadd.f32 %v7525_v9, %v7580_v48  ;;  %v5684_v9 = vadd.f32 %v7580_v48, %v7537_v0 }
 0x33b   : > { %v5657_v53 = vadd.f32 %v5656_v38, %v3406_v50  ;;  %5485 = vmatprep.mubr.msk.f32.mxu0 %vm589_vm0, %v3579_v47 }
 0x33c   : > { %5486 = vmatmul.mubr.msk.f32.gmra.mrb[66].mxu0 %vm589_vm0, %v3580_v35  ;;  %v3582_v31 = vmax.f32 %v5655_v4, 0.0 }
 0x33d   : > { %v3581_v13 = vmax.f32 %v5657_v53, 0.0  ;;  %v5437_v26 = vpop.f32.mrb[28].mxu1 }
 0x33e   : > { %v5659_v62 = vadd.f32 %v5658_v41, %v5437_v26  ;;  %v3416_v10 = vpop.f32.mrb[29].mxu1 }
 0x33f   : > { %v5661_v54 = vadd.f32 %v5660_v61, %v3416_v10  ;;  %5488 = vmatprep.mubr.msk.f32.mxu0 %vm589_vm0, %v3581_v13  ;;  %v5682_v61 = vadd.f32 %v7535_v44, %v7580_v48  ;;  %v5688_v44 = vadd.f32 %v7580_v48, %v7549_v30 }
 0x340   : > { %5489 = vmatmul.mubr.msk.f32.gmra.mrb[68].mxu0 %vm589_vm0, %v3582_v31  ;;  %v3584_v3 = vmax.f32 %v5659_v62, 0.0 }
 0x341   : > { %v3583_v21 = vmax.f32 %v5661_v54, 0.0  ;;  %v5440_v60 = vpop.f32.mrb[30].mxu1  ;;  %v5686_v54 = vadd.f32 %v7547_v12, %v7580_v48  ;;  %v5692_v12 = vadd.f32 %v7580_v48, %v7558_v23 }
 0x342   : > { %v5663_v49 = vadd.f32 %v5662_v16, %v5440_v60  ;;  %v3426_v19 = vpop.f32.mrb[31].mxu1 }
 0x343   : > { %v5665_v29 = vadd.f32 %v5664_v55, %v3426_v19  ;;  %5491 = vmatprep.mubr.msk.f32.mxu0 %vm589_vm0, %v3583_v21 }
 0x344   : > { %5492 = vmatmul.mubr.msk.f32.gmra.mrb[70].mxu0 %vm589_vm0, %v3584_v3  ;;  %v3586_v5 = vmax.f32 %v5663_v49, 0.0  ;;  %v5690_v49 = vadd.f32 %v7556_v27, %v7580_v48  ;;  %v5696_v27 = vadd.f32 %v7580_v48, %v7563_v1 }
 0x345   : > { %v3585_v58 = vmax.f32 %v5665_v29, 0.0  ;;  %v5443_v59 = vpop.f32.mrb[0].mxu1 }
 0x346   : > { %v5667_v34 = vadd.f32 %v5666_v33, %v5443_v59  ;;  %v3436_v24 = vpop.f32.mrb[1].mxu1  ;;  %v5694_v59 = vadd.f32 %v7561_v2, %v7580_v48  ;;  %v5700_v2 = vadd.f32 %v7580_v48, %v7567_v17 }
 0x347   : > { %v5669_v32 = vadd.f32 %v5668_v43, %v3436_v24  ;;  %5494 = vmatprep.mubr.msk.f32.mxu0 %vm589_vm0, %v3585_v58 }
 0x348   : > { %5495 = vmatmul.mubr.msk.f32.gmra.mrb[72].mxu0 %vm589_vm0, %v3586_v5  ;;  %v3588_v40 = vmax.f32 %v5667_v34, 0.0 }
 0x349   : > { %v3587_v56 = vmax.f32 %v5669_v32, 0.0  ;;  %v5446_v14 = vpop.f32.mrb[2].mxu1 }
 0x34a   : > { %v5671_v28 = vadd.f32 %v5670_v51, %v5446_v14  ;;  %v3446_v20 = vpop.f32.mrb[3].mxu1 }
 0x34b   : > { %v5673_v25 = vadd.f32 %v5672_v22, %v3446_v20  ;;  %5497 = vmatprep.mubr.msk.f32.mxu0 %vm589_vm0, %v3587_v56  ;;  %v5698_v22 = vadd.f32 %v7565_v57, %v7580_v48  ;;  %v5704_v57 = vadd.f32 %v7580_v48, %v7571_v15 }
 0x34c   : > { %5498 = vmatmul.mubr.msk.f32.gmra.mrb[74].mxu0 %vm589_vm0, %v3588_v40  ;;  %v3590_v18 = vmax.f32 %v5671_v28, 0.0 }
 0x34d   : > { %v3589_v52 = vmax.f32 %v5673_v25, 0.0  ;;  %v5449_v8 = vpop.f32.mrb[4].mxu1  ;;  %v5702_v25 = vadd.f32 %v7569_v46, %v7580_v48  ;;  %v5708_v46 = vadd.f32 %v7580_v48, %v7575_v63  ;;  %v7672_v63 = vld [vmem:[%s7832_s6] ss:$0 sm:$0xff] }
 0x34e   : > { %v5675_v7 = vadd.f32 %v5674_v45, %v5449_v8  ;;  %v3456_v38 = vpop.f32.mrb[5].mxu1 }
 0x34f   : > { %v5677_v47 = vadd.f32 %v5676_v6, %v3456_v38  ;;  %5500 = vmatprep.mubr.msk.f32.mxu0 %vm589_vm0, %v3589_v52 }
 0x350   : > { %5501 = vmatmul.mubr.msk.f32.gmra.mrb[76].mxu0 %vm589_vm0, %v3590_v18  ;;  %v3592_v50 = vmax.f32 %v5675_v7, 0.0  ;;  %v5706_v7 = vadd.f32 %v7573_v42, %v7580_v48 }
 0x351   : > { %v3591_v35 = vmax.f32 %v5677_v47, 0.0  ;;  %v5452_v4 = vpop.f32.mrb[6].mxu1 }
 0x352   : > { %v5679_v39 = vadd.f32 %v5678_v11, %v5452_v4  ;;  %v3466_v53 = vpop.f32.mrb[7].mxu1 }
 0x353   : > { %v5681_v41 = vadd.f32 %v5680_v37, %v3466_v53  ;;  %5503 = vmatprep.mubr.msk.f32.mxu0 %vm589_vm0, %v3591_v35 }
 0x354   : > { %5504 = vmatmul.mubr.msk.f32.gmra.mrb[78].mxu0 %vm589_vm0, %v3592_v50  ;;  %v3594_v31 = vmax.f32 %v5679_v39, 0.0 }
 0x355   : > { %v3593_v13 = vmax.f32 %v5681_v41, 0.0  ;;  %v5455_v26 = vpop.f32.mrb[8].mxu1  ;;  %v5986_v41 = vld [vmem:[%s6197_s15 + $0x8] sm:$0xff] }
 0x356   : > { %v5683_v36 = vadd.f32 %v5682_v61, %v5455_v26  ;;  %v3476_v62 = vpop.f32.mrb[9].mxu1 }
 0x357   : > { %v5685_v10 = vadd.f32 %v5684_v9, %v3476_v62  ;;  %5506 = vmatprep.mubr.msk.f32.mxu0 %vm589_vm0, %v3593_v13  ;;  %v5987_v9 = vld [vmem:[%s6197_s15] sm:$0xff] }
 0x358   : > { %5507 = vmatmul.mubr.msk.f32.gmra.mrb[80].mxu0 %vm589_vm0, %v3594_v31  ;;  %v3596_v21 = vmax.f32 %v5683_v36, 0.0 }
 0x359   : > { %v3595_v16 = vmax.f32 %v5685_v10, 0.0  ;;  %v5458_v55 = vpop.f32.mrb[10].mxu1 }
 0x35a   : > { %v5687_v0 = vadd.f32 %v5686_v54, %v5458_v55  ;;  %v3486_v60 = vpop.f32.mrb[11].mxu1  ;;  %v5989_v55 = vld [vmem:[%s6197_s15 + $0x10] sm:$0xff] }
 0x35b   : > { %v5689_v3 = vadd.f32 %v5688_v44, %v3486_v60  ;;  %5509 = vmatprep.mubr.msk.f32.mxu0 %vm589_vm0, %v3595_v16  ;;  %v5988_v44 = vld [vmem:[%s6197_s15 + $0x18] sm:$0xff] }
 0x35c   : > { %5510 = vmatmul.mubr.msk.f32.gmra.mrb[82].mxu0 %vm589_vm0, %v3596_v21  ;;  %v3598_v33 = vmax.f32 %v5687_v0, 0.0 }
 0x35d   : > { %v3597_v19 = vmax.f32 %v5689_v3, 0.0  ;;  %v5461_v29 = vpop.f32.mrb[12].mxu1 }
 0x35e   : > { %v5691_v30 = vadd.f32 %v5690_v49, %v5461_v29  ;;  %v3496_v43 = vpop.f32.mrb[13].mxu1  ;;  %v5990_v29 = vld [vmem:[%s6197_s15 + $0x28] sm:$0xff] }
 0x35f   : > { %v5693_v58 = vadd.f32 %v5692_v12, %v3496_v43  ;;  %5512 = vmatprep.mubr.msk.f32.mxu0 %vm589_vm0, %v3597_v19 }
 0x360   : > { %5513 = vmatmul.mubr.msk.f32.gmra.mrb[84].mxu0 %vm589_vm0, %v3598_v33  ;;  %v3600_v24 = vmax.f32 %v5691_v30, 0.0  ;;  %v5991_v30 = vld [vmem:[%s6197_s15 + $0x20] sm:$0xff] }
 0x361   : > { %v3599_v5 = vmax.f32 %v5693_v58, 0.0  ;;  %v5464_v34 = vpop.f32.mrb[14].mxu1 }
 0x362   : > { %v5695_v23 = vadd.f32 %v5694_v59, %v5464_v34  ;;  %v3506_v32 = vpop.f32.mrb[15].mxu1 }
 0x363   : > { %v5697_v51 = vadd.f32 %v5696_v27, %v3506_v32  ;;  %5515 = vmatprep.mubr.msk.f32.mxu0 %vm589_vm0, %v3599_v5 }
 0x364   : > { %5516 = vmatmul.mubr.msk.f32.gmra.mrb[86].mxu0 %vm589_vm0, %v3600_v24  ;;  %v3602_v40 = vmax.f32 %v5695_v23, 0.0  ;;  %v5992_v23 = vld [vmem:[%s6197_s15 + $0x38] sm:$0xff] }
 0x365   : > { %v3601_v56 = vmax.f32 %v5697_v51, 0.0  ;;  %v5467_v14 = vpop.f32.mrb[16].mxu1  ;;  %v5993_v51 = vld [vmem:[%s6197_s15 + $0x30] sm:$0xff] }
 0x366   : > { %v5699_v1 = vadd.f32 %v5698_v22, %v5467_v14  ;;  %v3516_v28 = vpop.f32.mrb[17].mxu1 }
 0x367   : > { %v5701_v20 = vadd.f32 %v5700_v2, %v3516_v28  ;;  %5518 = vmatprep.mubr.msk.f32.mxu0 %vm589_vm0, %v3601_v56 }
 0x368   : > { %5519 = vmatmul.mubr.msk.f32.gmra.mrb[88].mxu0 %vm589_vm0, %v3602_v40  ;;  %v3604_v52 = vmax.f32 %v5699_v1, 0.0 }
 0x369   : > { %v3603_v45 = vmax.f32 %v5701_v20, 0.0  ;;  %v5470_v6 = vpop.f32.mrb[18].mxu1  ;;  %v5994_v20 = vld [vmem:[%s6197_s15 + $0x48] sm:$0xff] }
 0x36a   : > { %v5703_v17 = vadd.f32 %v5702_v25, %v5470_v6  ;;  %v3526_v8 = vpop.f32.mrb[19].mxu1 }
 0x36b   : > { %v5705_v18 = vadd.f32 %v5704_v57, %v3526_v8  ;;  %5521 = vmatprep.mubr.msk.f32.mxu0 %vm589_vm0, %v3603_v45  ;;  %v5995_v57 = vld [vmem:[%s6197_s15 + $0x40] sm:$0xff] }
 0x36c   : > { %5522 = vmatmul.mubr.msk.f32.gmra.mrb[90].mxu0 %vm589_vm0, %v3604_v52  ;;  %v3606_v47 = vmax.f32 %v5703_v17, 0.0 }
 0x36d   : > { %v3605_v38 = vmax.f32 %v5705_v18, 0.0  ;;  %v5473_v15 = vpop.f32.mrb[20].mxu1 }
 0x36e   : > { %v5707_v11 = vadd.f32 %v5706_v7, %v5473_v15  ;;  %v3536_v37 = vpop.f32.mrb[21].mxu1  ;;  %v5997_v15 = vld [vmem:[%s6197_s15 + $0x50] sm:$0xff] }
 0x36f   : > { %v5709_v35 = vadd.f32 %v5708_v46, %v3536_v37  ;;  %5524 = vmatprep.mubr.msk.f32.mxu0 %vm589_vm0, %v3605_v38  ;;  %v5996_v46 = vld [vmem:[%s6197_s15 + $0x58] sm:$0xff] }
 0x370   : > { %5525 = vmatmul.mubr.msk.f32.gmra.mrb[92].mxu0 %vm589_vm0, %v3606_v47  ;;  %v3608_v42 = vmax.f32 %v5707_v11, 0.0 }
 0x371   : > { %v3607_v4 = vmax.f32 %v5709_v35, 0.0 }
 0x373   : > { %5527 = vmatprep.mubr.msk.f32.mxu0 %vm589_vm0, %v3607_v4 }
 0x374   : > { %5528 = vmatmul.mubr.msk.f32.gmra.mrb[94].mxu0 %vm589_vm0, %v3608_v42 }
 0x40b   : > { %v5484_v48 = vpop.f32.mrb[64].mxu0 }
 0x40c   : > { %v3788_v50 = vadd.f32 %v5484_v48, %v7672_v63  ;;  %v3782_v39 = vpop.f32.mrb[65].mxu0 }
 0x40d   : > { %v3783_v53 = vadd.f32 %v7672_v63, %v3782_v39 }
 0x40e   : > { %v3942_v61 = vadd.f32 %v5986_v41, %v3788_v50  ;;  %v5998_v50 = vld [vmem:[%s6197_s15 + $0x68] sm:$0xff] }
 0x40f   : > { %v3941_v13 = vadd.f32 %v5987_v9, %v3783_v53  ;;  %v5487_v26 = vpop.f32.mrb[66].mxu0  ;;  %v5999_v53 = vld [vmem:[%s6197_s15 + $0x60] sm:$0xff] }
 0x410   : > { %v3974_v31 = vmax.f32 %v3942_v61, 0.0  ;;  %v3798_v36 = vadd.f32 %v5487_v26, %v7672_v63  ;;  %v3792_v62 = vpop.f32.mrb[67].mxu0 }
 0x411   : > { %v3973_v10 = vmax.f32 %v3941_v13, 0.0  ;;  %v3793_v54 = vadd.f32 %v7672_v63, %v3792_v62  ;;  %v6000_v62 = vld [vmem:[%s6197_s15 + $0x78] sm:$0xff] }
 0x412   : > { %4006 = vst [vmem:[%s7682_s20 + $0x8] sm:$0xff] %v3974_v31  ;;  %v3944_v16 = vadd.f32 %v5988_v44, %v3798_v36 }
 0x413   : > { %4005 = vst [vmem:[%s7682_s20] sm:$0xff] %v3973_v10  ;;  %v3943_v21 = vadd.f32 %v5989_v55, %v3793_v54  ;;  %v5490_v0 = vpop.f32.mrb[68].mxu0  ;;  %v6001_v54 = vld [vmem:[%s6197_s15 + $0x70] sm:$0xff] }
 0x414   : > { %v3976_v60 = vmax.f32 %v3944_v16, 0.0  ;;  %v3808_v3 = vadd.f32 %v5490_v0, %v7672_v63  ;;  %v3802_v49 = vpop.f32.mrb[69].mxu0 }
 0x415   : > { %v3975_v12 = vmax.f32 %v3943_v21, 0.0  ;;  %v3803_v19 = vadd.f32 %v7672_v63, %v3802_v49  ;;  %v6002_v49 = vld [vmem:[%s6197_s15 + $0x88] sm:$0xff] }
 0x416   : > { %4008 = vst [vmem:[%s7682_s20 + $0x18] sm:$0xff] %v3976_v60  ;;  %v3946_v33 = vadd.f32 %v5990_v29, %v3808_v3 }
 0x417   : > { %4007 = vst [vmem:[%s7682_s20 + $0x10] sm:$0xff] %v3975_v12  ;;  %v3945_v43 = vadd.f32 %v5991_v30, %v3803_v19  ;;  %v5493_v58 = vpop.f32.mrb[70].mxu0  ;;  %v6003_v19 = vld [vmem:[%s6197_s15 + $0x80] sm:$0xff] }
 0x418   : > { %v3978_v59 = vmax.f32 %v3946_v33, 0.0  ;;  %v3818_v27 = vadd.f32 %v5493_v58, %v7672_v63  ;;  %v3812_v5 = vpop.f32.mrb[71].mxu0 }
 0x419   : > { %v3977_v34 = vmax.f32 %v3945_v43, 0.0  ;;  %v3813_v24 = vadd.f32 %v7672_v63, %v3812_v5  ;;  %v6004_v5 = vld [vmem:[%s6197_s15 + $0x98] sm:$0xff] }
 0x41a   : > { %4010 = vst [vmem:[%s7682_s20 + $0x28] sm:$0xff] %v3978_v59  ;;  %v3948_v32 = vadd.f32 %v5992_v23, %v3818_v27 }
 0x41b   : > { %4009 = vst [vmem:[%s7682_s20 + $0x20] sm:$0xff] %v3977_v34  ;;  %v3947_v22 = vadd.f32 %v5993_v51, %v3813_v24  ;;  %v5496_v2 = vpop.f32.mrb[72].mxu0  ;;  %v6005_v24 = vld [vmem:[%s6197_s15 + $0x90] sm:$0xff] }
 0x41c   : > { %v3980_v56 = vmax.f32 %v3948_v32, 0.0  ;;  %v3828_v14 = vadd.f32 %v5496_v2, %v7672_v63  ;;  %v3822_v40 = vpop.f32.mrb[73].mxu0 }
 0x41d   : > { %v3979_v1 = vmax.f32 %v3947_v22, 0.0  ;;  %v3823_v28 = vadd.f32 %v7672_v63, %v3822_v40  ;;  %v6006_v40 = vld [vmem:[%s6197_s15 + $0xa8] sm:$0xff] }
 0x41e   : > { %4012 = vst [vmem:[%s7682_s20 + $0x38] sm:$0xff] %v3980_v56  ;;  %v3950_v25 = vadd.f32 %v5994_v20, %v3828_v14 }
 0x41f   : > { %4011 = vst [vmem:[%s7682_s20 + $0x30] sm:$0xff] %v3979_v1  ;;  %v3949_v45 = vadd.f32 %v5995_v57, %v3823_v28  ;;  %v5499_v6 = vpop.f32.mrb[74].mxu0  ;;  %v6007_v28 = vld [vmem:[%s6197_s15 + $0xa0] sm:$0xff] }
 0x420   : > { %v3982_v52 = vmax.f32 %v3950_v25, 0.0  ;;  %v3838_v17 = vadd.f32 %v5499_v6, %v7672_v63  ;;  %v3832_v8 = vpop.f32.mrb[75].mxu0 }
 0x421   : > { %v3981_v18 = vmax.f32 %v3949_v45, 0.0  ;;  %v3833_v7 = vadd.f32 %v7672_v63, %v3832_v8  ;;  %v6008_v8 = vld [vmem:[%s6197_s15 + $0xb8] sm:$0xff] }
 0x422   : > { %4014 = vst [vmem:[%s7682_s20 + $0x48] sm:$0xff] %v3982_v52  ;;  %v3952_v38 = vadd.f32 %v5996_v46, %v3838_v17 }
 0x423   : > { %4013 = vst [vmem:[%s7682_s20 + $0x40] sm:$0xff] %v3981_v18  ;;  %v3951_v47 = vadd.f32 %v5997_v15, %v3833_v7  ;;  %v5502_v11 = vpop.f32.mrb[76].mxu0  ;;  %v6009_v7 = vld [vmem:[%s6197_s15 + $0xb0] sm:$0xff] }
 0x424   : > { %v3984_v37 = vmax.f32 %v3952_v38, 0.0  ;;  %v3848_v35 = vadd.f32 %v5502_v11, %v7672_v63  ;;  %v3842_v4 = vpop.f32.mrb[77].mxu0 }
 0x425   : > { %v3983_v42 = vmax.f32 %v3951_v47, 0.0  ;;  %v3843_v48 = vadd.f32 %v7672_v63, %v3842_v4  ;;  %v6010_v4 = vld [vmem:[%s6197_s15 + $0xc8] sm:$0xff] }
 0x426   : > { %4016 = vst [vmem:[%s7682_s20 + $0x58] sm:$0xff] %v3984_v37  ;;  %v3954_v39 = vadd.f32 %v5998_v50, %v3848_v35 }
 0x427   : > { %4015 = vst [vmem:[%s7682_s20 + $0x50] sm:$0xff] %v3983_v42  ;;  %v3953_v41 = vadd.f32 %v5999_v53, %v3843_v48  ;;  %v5505_v61 = vpop.f32.mrb[78].mxu0  ;;  %v6011_v48 = vld [vmem:[%s6197_s15 + $0xc0] sm:$0xff] }
 0x428   : > { %v3986_v9 = vmax.f32 %v3954_v39, 0.0  ;;  %v3858_v13 = vadd.f32 %v5505_v61, %v7672_v63  ;;  %v3852_v26 = vpop.f32.mrb[79].mxu0 }
 0x429   : > { %v3985_v31 = vmax.f32 %v3953_v41, 0.0  ;;  %v3853_v36 = vadd.f32 %v7672_v63, %v3852_v26  ;;  %v6012_v26 = vld [vmem:[%s6197_s15 + $0xd8] sm:$0xff] }
 0x42a   : > { %4018 = vst [vmem:[%s7682_s20 + $0x68] sm:$0xff] %v3986_v9  ;;  %v3956_v10 = vadd.f32 %v6000_v62, %v3858_v13 }
 0x42b   : > { %4017 = vst [vmem:[%s7682_s20 + $0x60] sm:$0xff] %v3985_v31  ;;  %v3955_v44 = vadd.f32 %v6001_v54, %v3853_v36  ;;  %v5508_v16 = vpop.f32.mrb[80].mxu0  ;;  %v6013_v36 = vld [vmem:[%s6197_s15 + $0xd0] sm:$0xff] }
 0x42c   : > { %v3988_v55 = vmax.f32 %v3956_v10, 0.0  ;;  %v3868_v21 = vadd.f32 %v5508_v16, %v7672_v63  ;;  %v3862_v0 = vpop.f32.mrb[81].mxu0 }
 0x42d   : > { %v3987_v60 = vmax.f32 %v3955_v44, 0.0  ;;  %v3863_v3 = vadd.f32 %v7672_v63, %v3862_v0  ;;  %v6014_v0 = vld [vmem:[%s6197_s15 + $0xe8] sm:$0xff] }
 0x42e   : > { %4020 = vst [vmem:[%s7682_s20 + $0x78] sm:$0xff] %v3988_v55  ;;  %v3958_v12 = vadd.f32 %v6002_v49, %v3868_v21 }
 0x42f   : > { %4019 = vst [vmem:[%s7682_s20 + $0x70] sm:$0xff] %v3987_v60  ;;  %v3957_v29 = vadd.f32 %v6003_v19, %v3863_v3  ;;  %v5511_v33 = vpop.f32.mrb[82].mxu0  ;;  %v6015_v3 = vld [vmem:[%s6197_s15 + $0xe0] sm:$0xff] }
 0x430   : > { %v3990_v30 = vmax.f32 %v3958_v12, 0.0  ;;  %v3878_v43 = vadd.f32 %v5511_v33, %v7672_v63  ;;  %v3872_v58 = vpop.f32.mrb[83].mxu0 }
 0x431   : > { %v3989_v59 = vmax.f32 %v3957_v29, 0.0  ;;  %v3873_v27 = vadd.f32 %v7672_v63, %v3872_v58  ;;  %v6016_v58 = vld [vmem:[%s6197_s15 + $0xf8] sm:$0xff] }
 0x432   : > { %4022 = vst [vmem:[%s7682_s20 + $0x88] sm:$0xff] %v3990_v30  ;;  %v3960_v34 = vadd.f32 %v6004_v5, %v3878_v43 }
 0x433   : > { %4021 = vst [vmem:[%s7682_s20 + $0x80] sm:$0xff] %v3989_v59  ;;  %v3959_v23 = vadd.f32 %v6005_v24, %v3873_v27  ;;  %v5514_v32 = vpop.f32.mrb[84].mxu0  ;;  %v6017_v27 = vld [vmem:[%s6197_s15 + $0xf0] sm:$0xff]  ;;  %s6083_s15 = smov [#allocation3]  }
 0x434   : > { %v3992_v51 = vmax.f32 %v3960_v34, 0.0  ;;  %v3888_v22 = vadd.f32 %v5514_v32, %v7672_v63  ;;  %v3882_v2 = vpop.f32.mrb[85].mxu0  ;;  %s6022_s13 = sshll.u32 %s6083_s15, 4  ;;  %s6023_s13 = int_to_ptr.vmem [resolvable:$false] %s6022_s13 }
 0x435   : > { %v3991_v56 = vmax.f32 %v3959_v23, 0.0  ;;  %v3883_v14 = vadd.f32 %v7672_v63, %v3882_v2  ;;  %s6024_s14 = scalar_lea.vmem %s6023_s13, 8192  ;;  %p6025_p0 = scmp.lt.s32.totalorder %s7779_s22, %s6023_s13 }
 0x436   : > { %4024 = vst [vmem:[%s7682_s20 + $0x98] sm:$0xff] %v3992_v51  ;;  %v3962_v1 = vadd.f32 %v6006_v40, %v3888_v22  ;;  %p6026_p1 = scmp.lt.s32.totalorder %s6024_s14, %s6018_s9 }
 0x437   : > { %4023 = vst [vmem:[%s7682_s20 + $0x90] sm:$0xff] %v3991_v56  ;;  %v3961_v20 = vadd.f32 %v6007_v28, %v3883_v14  ;;  %v5517_v25 = vpop.f32.mrb[86].mxu0 }
 0x438   : > { %v3994_v57 = vmax.f32 %v3962_v1, 0.0  ;;  %v3898_v45 = vadd.f32 %v5517_v25, %v7672_v63  ;;  %v3892_v6 = vpop.f32.mrb[87].mxu0  ;;  %p6027_p2 = por %p6026_p1, %p6025_p0 }
 0x439   : > { %v3993_v52 = vmax.f32 %v3961_v20, 0.0  ;;  %v3893_v17 = vadd.f32 %v7672_v63, %v3892_v6 }
 0x43a   : > { %4026 = vst [vmem:[%s7682_s20 + $0xa8] sm:$0xff] %v3994_v57  ;;  %v3964_v18 = vadd.f32 %v6008_v8, %v3898_v45  ;;  %p6028_p3 = pnand %p6027_p2, %p6021_p13 }
 0x43b   : > { %4025 = vst [vmem:[%s7682_s20 + $0xa0] sm:$0xff] %v3993_v52  ;;  %v3963_v46 = vadd.f32 %v6009_v7, %v3893_v17  ;;  %v5520_v38 = vpop.f32.mrb[88].mxu0 }
 0x43c   : > { %v3996_v15 = vmax.f32 %v3964_v18, 0.0  ;;  %v3908_v47 = vadd.f32 %v5520_v38, %v7672_v63  ;;  %v3902_v11 = vpop.f32.mrb[89].mxu0 }
 0x43d   : > { %v3995_v37 = vmax.f32 %v3963_v46, 0.0  ;;  %v3903_v35 = vadd.f32 %v7672_v63, %v3902_v11 }
 0x43e   : > { %4028 = vst [vmem:[%s7682_s20 + $0xb8] sm:$0xff] %v3996_v15  ;;  %v3966_v42 = vadd.f32 %v6010_v4, %v3908_v47 }
 0x43f   : > { %4027 = vst [vmem:[%s7682_s20 + $0xb0] sm:$0xff] %v3995_v37  ;;  %v3965_v50 = vadd.f32 %v6011_v48, %v3903_v35  ;;  %v5523_v39 = vpop.f32.mrb[90].mxu0 }
 0x440   : > { %v3998_v53 = vmax.f32 %v3966_v42, 0.0  ;;  %v3918_v41 = vadd.f32 %v5523_v39, %v7672_v63  ;;  %v3912_v61 = vpop.f32.mrb[91].mxu0 }
 0x441   : > { %v3997_v9 = vmax.f32 %v3965_v50, 0.0  ;;  %v3913_v13 = vadd.f32 %v7672_v63, %v3912_v61 }
 0x442   : > { %4030 = vst [vmem:[%s7682_s20 + $0xc8] sm:$0xff] %v3998_v53  ;;  %v3968_v31 = vadd.f32 %v6012_v26, %v3918_v41 }
 0x443   : > { %4029 = vst [vmem:[%s7682_s20 + $0xc0] sm:$0xff] %v3997_v9  ;;  %v3967_v62 = vadd.f32 %v6013_v36, %v3913_v13  ;;  %v5526_v10 = vpop.f32.mrb[92].mxu0 }
 0x444   : > { %v4000_v54 = vmax.f32 %v3968_v31, 0.0  ;;  %v3928_v44 = vadd.f32 %v5526_v10, %v7672_v63  ;;  %v3922_v16 = vpop.f32.mrb[93].mxu0 }
 0x445   : > { %v3999_v55 = vmax.f32 %v3967_v62, 0.0  ;;  %v3923_v21 = vadd.f32 %v7672_v63, %v3922_v16 }
 0x446   : > { %4032 = vst [vmem:[%s7682_s20 + $0xd8] sm:$0xff] %v4000_v54  ;;  %v3970_v60 = vadd.f32 %v6014_v0, %v3928_v44 }
 0x447   : > { %4031 = vst [vmem:[%s7682_s20 + $0xd0] sm:$0xff] %v3999_v55  ;;  %v3969_v49 = vadd.f32 %v6015_v3, %v3923_v21  ;;  %v5529_v12 = vpop.f32.mrb[94].mxu0 }
 0x448   : > { %v4002_v19 = vmax.f32 %v3970_v60, 0.0  ;;  %v3938_v29 = vadd.f32 %v5529_v12, %v7672_v63  ;;  %v3932_v33 = vpop.f32.mrb[95].mxu0 }
 0x449   : > { %v4001_v30 = vmax.f32 %v3969_v49, 0.0  ;;  %v3933_v43 = vadd.f32 %v7672_v63, %v3932_v33 }
 0x44a   : > { %4034 = vst [vmem:[%s7682_s20 + $0xe8] sm:$0xff] %v4002_v19  ;;  %v3972_v59 = vadd.f32 %v6016_v58, %v3938_v29 }
 0x44b   : > { %4033 = vst [vmem:[%s7682_s20 + $0xe0] sm:$0xff] %v4001_v30  ;;  %v3971_v5 = vadd.f32 %v6017_v27, %v3933_v43 }
 0x44c   : > { %v4004_v34 = vmax.f32 %v3972_v59, 0.0 }
 0x44d   : > { %v4003_v63 = vmax.f32 %v3971_v5, 0.0 }
 0x44e   : > { %4036 = vst [vmem:[%s7682_s20 + $0xf8] sm:$0xff] %v4004_v34 }
 0x44f   : > { %4035 = vst [vmem:[%s7682_s20 + $0xf0] sm:$0xff] %v4003_v63 }
 0x450   : > { %6031 = shalt.err (!%p6028_p3)
}
 0x451   : > { %s6032_s16 = scalar_lea.hbm %s7777_s8, 4096  ;;  %s6036_s19 = scalar_lea.hbm %s7833_s7, 8192 }
 0x452   : > { %p6033_p4 = scmp.ne.s32.totalorder %s7777_s8, %s6032_s16  ;;  %p6037_p9 = scmp.lt.u32.totalorder %s7777_s8, %s7833_s7 }
 0x453   : > { %p6038_p10 = scmp.lt.u32.totalorder %s6036_s19, %s6032_s16  ;;  %p6040_p12 = scmp.lt.u32.totalorder %s6032_s16, %s7777_s8 }
 0x454   : > { %p6034_p7 = pnand %p6033_p4, %p6164_p5 }
 0x455   : > { %p6039_p11 = por %p6038_p10, %p6037_p9 }
 0x456   : > { %p6035_p8 = pneg %p6034_p7 }
 0x457   : > { %p6041_p13 = por %p6040_p12, %p6039_p11 }
 0x459   : > { %p6042_p0 = pnand %p6041_p13, %p6035_p8 }
 0x45b   : > { %6045 = shalt.err (!%p6042_p0)
}
 0x45c   : > { %s6084_s23 = smov 128   ;;  %s6085_s29 = smov 8  }
 0x45d   : > { %5934 = dma.vmem_to_hbm [thread:$0]  (%p6164_p5), %s7779_s22, 4096, %s7777_s8, %s7785_s28, %s6084_s23, %s6084_s23, %s6085_s29  }
 0x45e PF: > { %p5940_p1 = scmp.ge.s32.totalorder %s6080_s27, 2  ;;  %s4066_s9 = sand.u32 1, %s6068_s24  }
 0x45f   : > { %s4067_s15 = scalar_lea.sflag [#allocation4], %s4066_s9 }
 0x460   : > { %p5937_p2 = pnand %p5940_p1, %p6168_p6 }
 0x462   : > { %6063 = dma.done.wait (!%p5937_p2), %s4067_s15, 4096  }
 0x463   : > { %6065 = vsyncadd (!%p5937_p2), %s4067_s15, 4294963200  ;;  %p17_p3 = scmp.ge.s32.totalorder %s6151_s30, 4   ;;  %s7914_s24 = smov %s6072_s25 }
 0x464   : > { %s7915_s25 = smov %s6076_s26  ;;  %s7916_s26 = smov %s6162_s10 }
 0x465   : > { %s7917_s27 = smov %s6151_s30  ;;  %19 = sbr.rel (!%p17_p3) target bundleno = 3 (0x3), region = 93 }
 0x46c   :  { %4072 = vsyncpa [#allocation4], 1 }
 0x46d   :  { %4074 = vsyncpa [#allocation4 + $0x1], 1 }

</bundles_post_ra>
